<compile_context>
chip_gen: v6e
topology: v6e:2x2x1
jax: 0.10.0
libtpu: 0.0.40
codegen_flags: <defaults>
</compile_context>

<pallas_src>
import math

import jax
import jax.numpy as jnp
from jax.experimental import pallas as pl
from jax.experimental.pallas import tpu as pltpu

# Small, self-consistent shapes (real BERT would be H=768, NH=12, etc.)
B, S, H = 2, 8, 32          # batch, seq len, hidden
NH, HD = 2, 16              # heads, head dim (NH * HD == H)
FF = 64                     # feed-forward dim
VOCAB = 50
N_LAYERS = 2
N_CLASSES = 10
CLS_PAD = 128               # lane-dense classifier output width (first N_CLASSES real)
LN_EPS = 1e-12

# Row layout of the packed (N_VEC_ROWS, 128) bias / LayerNorm-param table.
VEC_ROWS_PER_LAYER = 8      # bqkv, bo, ln1_g, ln1_b, b1, b2, ln2_g, ln2_b
VEC_EMB_G, VEC_EMB_B = 0, 1
VEC_LAYER0 = 2
VEC_POOL_B = VEC_LAYER0 + N_LAYERS * VEC_ROWS_PER_LAYER
VEC_CLS_B = VEC_POOL_B + 1
N_VEC_ROWS = VEC_CLS_B + 1


def _layernorm(x, gamma, beta):
    mu = jnp.mean(x, axis=-1, keepdims=True)
    var = jnp.mean((x - mu) ** 2, axis=-1, keepdims=True)
    return (x - mu) * jax.lax.rsqrt(var + LN_EPS) * gamma + beta


def _mm(x, w):
    """bf16 MXU matmul with f32 accumulation (weights are pre-cast to bf16)."""
    return jnp.dot(x.astype(jnp.bfloat16), w, preferred_element_type=jnp.float32)


# ---------------------------------------------------------------------------
# Fused Pallas kernel (runs once, no grid)
# ---------------------------------------------------------------------------

def _attention(x, bias, wqkv, bqkv, wo, bo):
    """x: (B*S, H) f32, bias: (B, S) additive mask.  All 2-D, no head stacking.

    wqkv columns are head-contiguous ([Q_h | K_h | V_h] per head) and the
    1/sqrt(HD) score scale is already folded into the Q columns (offline).
    """
    qkv = _mm(x, wqkv) + bqkv                                   # (B*S, 3H), one MXU pass
    ctx_rows = []
    for b in range(B):
        rows = qkv[b * S:(b + 1) * S, :]                        # (S, 3H) static sublane slice
        bias_b = bias[b:b + 1, :]                               # (1, S) -> broadcasts over scores
        head_ctx = []
        for h in range(NH):
            c0 = h * 3 * HD
            q = rows[:, c0:c0 + HD]                             # (S, HD) static lane slices
            k = rows[:, c0 + HD:c0 + 2 * HD]
            v = rows[:, c0 + 2 * HD:c0 + 3 * HD]
            s = jax.lax.dot_general(q, k, (((1,), (1,)), ((), ())),
                                    preferred_element_type=jnp.float32)  # (S, S) = q @ k.T
            s = s + bias_b
            s = s - jnp.max(s, axis=-1, keepdims=True)
            p = jnp.exp(s)
            p = p * pl.reciprocal(jnp.sum(p, axis=-1, keepdims=True), approx=True)
            head_ctx.append(jnp.dot(p, v, preferred_element_type=jnp.float32))  # (S, HD)
        ctx_rows.append(jnp.concatenate(head_ctx, axis=1))      # (S, H)
    ctx = jnp.concatenate(ctx_rows, axis=0)                     # (B*S, H)
    # Single output projection against the original (H, H) weight.
    return _mm(ctx, wo) + bo


def bert_fused_kernel(emb_ref, bias_ref, wqkv_ref, wo_ref, w1_ref, w2_ref,
                      headw_ref, vecs_ref, o_ref, x_scr):
    vecs = vecs_ref[...]                                        # (N_VEC_ROWS, 128) f32
    bias = bias_ref[...]                                        # (B, S)
    x = _layernorm(emb_ref[...],
                   vecs[VEC_EMB_G:VEC_EMB_G + 1, :H],
                   vecs[VEC_EMB_B:VEC_EMB_B + 1, :H])           # (B*S, H) residual stream

    for l in range(N_LAYERS):
        r0 = VEC_LAYER0 + l * VEC_ROWS_PER_LAYER
        wqkv = wqkv_ref[l * H:(l + 1) * H, :]                   # (H, 3H) bf16
        wo = wo_ref[l * H:(l + 1) * H, :]                       # (H, H)  bf16
        w1 = w1_ref[l * H:(l + 1) * H, :]                       # (H, FF) bf16
        w2 = w2_ref[l * FF:(l + 1) * FF, :]                     # (FF, H) bf16
        bqkv = vecs[r0 + 0:r0 + 1, :3 * H]
        bo = vecs[r0 + 1:r0 + 2, :H]
        g1 = vecs[r0 + 2:r0 + 3, :H]
        be1 = vecs[r0 + 3:r0 + 4, :H]
        b1 = vecs[r0 + 4:r0 + 5, :FF]
        b2 = vecs[r0 + 5:r0 + 6, :H]
        g2 = vecs[r0 + 6:r0 + 7, :H]
        be2 = vecs[r0 + 7:r0 + 8, :H]

        attn = _attention(x, bias, wqkv, bqkv, wo, bo)
        x1 = _layernorm(x + attn, g1, be1)
        h = _mm(x1, w1) + b1
        # TODO(synk): HF BERT default is exact erf-GELU; tanh approximation kept
        # (Mosaic-safe transcendental path).
        h = jax.nn.gelu(h, approximate=True)
        ffn = _mm(h, w2) + b2
        x = _layernorm(x1 + ffn, g2, be2)

    # BERT pooler on each sequence's [CLS] token: one strided sublane read.
    x_scr[...] = x
    cls = x_scr[pl.ds(0, B, stride=S), :]                       # (B, H): rows 0, S, ...
    pooler_w = headw_ref[0:H, :H]                               # (H, H)   bf16
    cls_w = headw_ref[H:2 * H, :]                               # (H, 128) bf16
    pooled = jnp.tanh(_mm(cls, pooler_w) + vecs[VEC_POOL_B:VEC_POOL_B + 1, :H])
    # TODO(synk): nn.Dropout(0.5) treated as eval-mode identity (deterministic inference).
    logits = _mm(pooled, cls_w) + vecs[VEC_CLS_B:VEC_CLS_B + 1, :]
    o_ref[...] = jnp.maximum(logits, 0.0)                       # (B, CLS_PAD) lane-dense store


# ---------------------------------------------------------------------------
# Parameter init (deterministic synthetic "pretrained" weights)
# ---------------------------------------------------------------------------

def init_params(key):
    def normal(k, shape):
        return (0.02 * jax.random.normal(k, shape)).astype(jnp.float32)

    keys = jax.random.split(key, 8 + N_LAYERS)
    params = {
        "word_emb": normal(keys[0], (VOCAB, H)),
        "pos_emb": normal(keys[1], (S, H)),
        "tok_emb": normal(keys[2], (2, H)),
        "emb_ln_g": jnp.ones((1, H), jnp.float32),
        "emb_ln_b": jnp.zeros((1, H), jnp.float32),
        "pooler_w": normal(keys[3], (H, H)),
        "pooler_b": jnp.zeros((1, H), jnp.float32),
        "cls_w": normal(keys[4], (H, N_CLASSES)),
        "cls_b": jnp.zeros((1, N_CLASSES), jnp.float32),
        "layers": [],
    }
    for i in range(N_LAYERS):
        lk = jax.random.split(keys[8 + i], 6)
        params["layers"].append({
            "wq": normal(lk[0], (H, H)), "bq": jnp.zeros((1, H), jnp.float32),
            "wk": normal(lk[1], (H, H)), "bk": jnp.zeros((1, H), jnp.float32),
            "wv": normal(lk[2], (H, H)), "bv": jnp.zeros((1, H), jnp.float32),
            "wo": normal(lk[3], (H, H)), "bo": jnp.zeros((1, H), jnp.float32),
            "ln1_g": jnp.ones((1, H), jnp.float32),
            "ln1_b": jnp.zeros((1, H), jnp.float32),
            "w1": normal(lk[4], (H, FF)), "b1": jnp.zeros((1, FF), jnp.float32),
            "w2": normal(lk[5], (FF, H)), "b2": jnp.zeros((1, H), jnp.float32),
            "ln2_g": jnp.ones((1, H), jnp.float32),
            "ln2_b": jnp.zeros((1, H), jnp.float32),
        })
    return params


def _pad_row(v, width=CLS_PAD):
    v = jnp.asarray(v, jnp.float32)
    return jnp.zeros((1, width), jnp.float32).at[:, :v.shape[1]].set(v)


def prepare_weights(params):
    """One-time offline packing of all weights into 6 VMEM-friendly buffers.

    * QKV columns reordered head-contiguously, Q pre-scaled by 1/sqrt(HD).
    * Weight matrices stacked per kind along rows and pre-cast to bf16.
    * All bias / LayerNorm row-vectors packed into one lane-padded f32 table.
    """
    inv = 1.0 / math.sqrt(HD)
    wqkv_blk, wo_blk, w1_blk, w2_blk = [], [], [], []
    vec_rows = [_pad_row(params["emb_ln_g"]), _pad_row(params["emb_ln_b"])]

    for lp in params["layers"]:
        wq, bq = lp["wq"] * inv, lp["bq"] * inv        # fold softmax scale into Q
        cols, bcols = [], []
        for h in range(NH):
            sl = slice(h * HD, (h + 1) * HD)
            cols += [wq[:, sl], lp["wk"][:, sl], lp["wv"][:, sl]]
            bcols += [bq[:, sl], lp["bk"][:, sl], lp["bv"][:, sl]]
        wqkv_blk.append(jnp.concatenate(cols, axis=1))          # (H, 3H), head-contiguous
        wo_blk.append(lp["wo"])
        w1_blk.append(lp["w1"])
        w2_blk.append(lp["w2"])
        vec_rows += [_pad_row(jnp.concatenate(bcols, axis=1)), _pad_row(lp["bo"]),
                     _pad_row(lp["ln1_g"]), _pad_row(lp["ln1_b"]),
                     _pad_row(lp["b1"]), _pad_row(lp["b2"]),
                     _pad_row(lp["ln2_g"]), _pad_row(lp["ln2_b"])]

    pooler_w_pad = jnp.zeros((H, CLS_PAD), jnp.float32).at[:, :H].set(params["pooler_w"])
    cls_w_pad = jnp.zeros((H, CLS_PAD), jnp.float32).at[:, :N_CLASSES].set(params["cls_w"])
    vec_rows += [_pad_row(params["pooler_b"]), _pad_row(params["cls_b"])]

    bf16 = jnp.bfloat16
    return (
        jnp.concatenate(wqkv_blk, axis=0).astype(bf16),                    # (N_LAYERS*H, 3H)
        jnp.concatenate(wo_blk, axis=0).astype(bf16),                      # (N_LAYERS*H, H)
        jnp.concatenate(w1_blk, axis=0).astype(bf16),                      # (N_LAYERS*H, FF)
        jnp.concatenate(w2_blk, axis=0).astype(bf16),                      # (N_LAYERS*FF, H)
        jnp.concatenate([pooler_w_pad, cls_w_pad], axis=0).astype(bf16),   # (2H, 128)
        jnp.concatenate(vec_rows, axis=0),                                 # (N_VEC_ROWS, 128) f32
    )


# ---------------------------------------------------------------------------
# Forward: embedding gather (plain JAX glue) + one fused Pallas kernel
# ---------------------------------------------------------------------------

@jax.jit
def bert_classifier_forward(emb_tables, kernel_weights, input_ids, mask):
    word_emb, pos_emb, tok_emb = emb_tables
    # Embeddings (gather is glue in plain JAX), token_type_ids assumed all-zero.
    emb = word_emb[input_ids] + pos_emb[None, :, :] + tok_emb[0][None, None, :]
    emb = emb.astype(jnp.float32).reshape(B * S, H)

    # HF-BERT additive attention mask: 0 where attended, -10000 where masked.
    bias = (1.0 - mask.astype(jnp.float32)) * -10000.0          # (B, S)

    out_pad = pl.pallas_call(
        bert_fused_kernel,
        out_shape=jax.ShapeDtypeStruct((B, CLS_PAD), jnp.float32),
        scratch_shapes=[pltpu.VMEM((B * S, H), jnp.float32)],
        compiler_params=pltpu.CompilerParams(vmem_limit_bytes=16 * 1024 * 1024),
    )(emb, bias, *kernel_weights)
    return out_pad[:, :N_CLASSES]


if __name__ == "__main__":
    key = jax.random.PRNGKey(0)
    pkey, idkey = jax.random.split(key)
    params = init_params(pkey)
    emb_tables = (params["word_emb"], params["pos_emb"], params["tok_emb"])
    kernel_weights = prepare_weights(params)

    input_ids = jax.random.randint(idkey, (B, S), 0, VOCAB, dtype=jnp.int32)
    mask = jnp.array([[1, 1, 1, 1, 1, 1, 1, 1],
                      [1, 1, 1, 1, 1, 0, 0, 0]], dtype=jnp.int32)

    out = bert_classifier_forward(emb_tables, kernel_weights, input_ids, mask)
    out = jax.block_until_ready(out)
    assert out.shape == (B, N_CLASSES) and out.dtype == jnp.float32
    assert bool(jnp.all(out >= 0.0))  # ReLU output is non-negative
    print("KERNEL_OK")
</pallas_src>

<mosaic_0001>
module attributes {stable_mosaic.version = 11 : i64} {
  func.func @bert_fused_kernel(%arg0: memref<16x32xf32, #tpu.memory_space<vmem>>, %arg1: memref<2x8xf32, #tpu.memory_space<vmem>>, %arg2: memref<64x96xbf16, #tpu.memory_space<vmem>>, %arg3: memref<64x32xbf16, #tpu.memory_space<vmem>>, %arg4: memref<64x64xbf16, #tpu.memory_space<vmem>>, %arg5: memref<128x32xbf16, #tpu.memory_space<vmem>>, %arg6: memref<64x128xbf16, #tpu.memory_space<vmem>>, %arg7: memref<20x128xf32, #tpu.memory_space<vmem>>, %arg8: memref<2x128xf32, #tpu.memory_space<vmem>>, %arg9: memref<16x32xf32, #tpu.memory_space<vmem>>) attributes {dimension_semantics = [], scalar_prefetch = 0 : i64, scratch_operands = 1 : i64, tpu.core_type = #tpu.core_type<tc>} {
    %c0 = arith.constant 0 : index
    %c0_0 = arith.constant 0 : index
    %0 = vector.load %arg7[%c0, %c0_0] : memref<20x128xf32, #tpu.memory_space<vmem>>, vector<20x128xf32>
    %c0_1 = arith.constant 0 : index
    %c0_2 = arith.constant 0 : index
    %1 = vector.load %arg1[%c0_1, %c0_2] : memref<2x8xf32, #tpu.memory_space<vmem>>, vector<2x8xf32>
    %c0_3 = arith.constant 0 : index
    %c0_4 = arith.constant 0 : index
    %2 = vector.load %arg0[%c0_3, %c0_4] : memref<16x32xf32, #tpu.memory_space<vmem>>, vector<16x32xf32>
    %3 = vector.extract_strided_slice %0 {offsets = [0, 0], sizes = [1, 32], strides = [1, 1]} : vector<20x128xf32> to vector<1x32xf32>
    %4 = vector.extract_strided_slice %0 {offsets = [1, 0], sizes = [1, 32], strides = [1, 1]} : vector<20x128xf32> to vector<1x32xf32>
    %cst = arith.constant dense<0.000000e+00> : vector<16xf32>
    %5 = vector.multi_reduction <add>, %2, %cst [1] : vector<16x32xf32> to vector<16xf32>
    %6 = vector.shape_cast %5 : vector<16xf32> to vector<16x1xf32>
    %cst_5 = arith.constant 3.200000e+01 : f32
    %7 = vector.broadcast %cst_5 : f32 to vector<16x1xf32>
    %8 = arith.divf %6, %7 : vector<16x1xf32>
    %9 = vector.broadcast %8 : vector<16x1xf32> to vector<16x32xf32>
    %10 = arith.subf %2, %9 : vector<16x32xf32>
    %11 = arith.mulf %10, %10 : vector<16x32xf32>
    %cst_6 = arith.constant dense<0.000000e+00> : vector<16xf32>
    %12 = vector.multi_reduction <add>, %11, %cst_6 [1] : vector<16x32xf32> to vector<16xf32>
    %13 = vector.shape_cast %12 : vector<16xf32> to vector<16x1xf32>
    %cst_7 = arith.constant 3.200000e+01 : f32
    %14 = vector.broadcast %cst_7 : f32 to vector<16x1xf32>
    %15 = arith.divf %13, %14 : vector<16x1xf32>
    %16 = vector.broadcast %8 : vector<16x1xf32> to vector<16x32xf32>
    %17 = arith.subf %2, %16 : vector<16x32xf32>
    %cst_8 = arith.constant 9.99999996E-13 : f32
    %18 = vector.broadcast %cst_8 : f32 to vector<16x1xf32>
    %19 = arith.addf %15, %18 : vector<16x1xf32>
    %20 = math.rsqrt %19 : vector<16x1xf32>
    %21 = vector.broadcast %20 : vector<16x1xf32> to vector<16x32xf32>
    %22 = arith.mulf %17, %21 : vector<16x32xf32>
    %23 = vector.broadcast %3 : vector<1x32xf32> to vector<16x32xf32>
    %24 = arith.mulf %22, %23 : vector<16x32xf32>
    %25 = vector.broadcast %4 : vector<1x32xf32> to vector<16x32xf32>
    %26 = arith.addf %24, %25 : vector<16x32xf32>
    %c0_9 = arith.constant 0 : index
    %c0_10 = arith.constant 0 : index
    %27 = vector.load %arg2[%c0_9, %c0_10] : memref<64x96xbf16, #tpu.memory_space<vmem>>, vector<32x96xbf16>
    %c0_11 = arith.constant 0 : index
    %c0_12 = arith.constant 0 : index
    %28 = vector.load %arg3[%c0_11, %c0_12] : memref<64x32xbf16, #tpu.memory_space<vmem>>, vector<32x32xbf16>
    %c0_13 = arith.constant 0 : index
    %c0_14 = arith.constant 0 : index
    %29 = vector.load %arg4[%c0_13, %c0_14] : memref<64x64xbf16, #tpu.memory_space<vmem>>, vector<32x64xbf16>
    %c0_15 = arith.constant 0 : index
    %c0_16 = arith.constant 0 : index
    %30 = vector.load %arg5[%c0_15, %c0_16] : memref<128x32xbf16, #tpu.memory_space<vmem>>, vector<64x32xbf16>
    %31 = vector.extract_strided_slice %0 {offsets = [2, 0], sizes = [1, 96], strides = [1, 1]} : vector<20x128xf32> to vector<1x96xf32>
    %32 = vector.extract_strided_slice %0 {offsets = [3, 0], sizes = [1, 32], strides = [1, 1]} : vector<20x128xf32> to vector<1x32xf32>
    %33 = vector.extract_strided_slice %0 {offsets = [4, 0], sizes = [1, 32], strides = [1, 1]} : vector<20x128xf32> to vector<1x32xf32>
    %34 = vector.extract_strided_slice %0 {offsets = [5, 0], sizes = [1, 32], strides = [1, 1]} : vector<20x128xf32> to vector<1x32xf32>
    %35 = vector.extract_strided_slice %0 {offsets = [6, 0], sizes = [1, 64], strides = [1, 1]} : vector<20x128xf32> to vector<1x64xf32>
    %36 = vector.extract_strided_slice %0 {offsets = [7, 0], sizes = [1, 32], strides = [1, 1]} : vector<20x128xf32> to vector<1x32xf32>
    %37 = vector.extract_strided_slice %0 {offsets = [8, 0], sizes = [1, 32], strides = [1, 1]} : vector<20x128xf32> to vector<1x32xf32>
    %38 = vector.extract_strided_slice %0 {offsets = [9, 0], sizes = [1, 32], strides = [1, 1]} : vector<20x128xf32> to vector<1x32xf32>
    %39 = arith.truncf %26 : vector<16x32xf32> to vector<16x32xbf16>
    %cst_17 = arith.constant dense<0.000000e+00> : vector<16x96xf32>
    %40 = tpu.matmul %39, %27, %cst_17 {dimension_numbers = #tpu.dot_dimension_numbers<[1], [0], [0], [1], [0, 0, 1, 1], [], []>} : vector<16x32xbf16>, vector<32x96xbf16>, vector<16x96xf32> -> vector<16x96xf32>
    %41 = vector.broadcast %31 : vector<1x96xf32> to vector<16x96xf32>
    %42 = arith.addf %40, %41 : vector<16x96xf32>
    %43 = vector.extract_strided_slice %42 {offsets = [0, 0], sizes = [8, 96], strides = [1, 1]} : vector<16x96xf32> to vector<8x96xf32>
    %44 = vector.extract_strided_slice %1 {offsets = [0, 0], sizes = [1, 8], strides = [1, 1]} : vector<2x8xf32> to vector<1x8xf32>
    %45 = vector.extract_strided_slice %43 {offsets = [0, 0], sizes = [8, 16], strides = [1, 1]} : vector<8x96xf32> to vector<8x16xf32>
    %46 = vector.extract_strided_slice %43 {offsets = [0, 16], sizes = [8, 16], strides = [1, 1]} : vector<8x96xf32> to vector<8x16xf32>
    %47 = vector.extract_strided_slice %43 {offsets = [0, 32], sizes = [8, 16], strides = [1, 1]} : vector<8x96xf32> to vector<8x16xf32>
    %cst_18 = arith.constant dense<0.000000e+00> : vector<8x8xf32>
    %48 = tpu.matmul %45, %46, %cst_18 {dimension_numbers = #tpu.dot_dimension_numbers<[1], [1], [0], [0], [0, 0, 1, 0], [], []>} : vector<8x16xf32>, vector<8x16xf32>, vector<8x8xf32> -> vector<8x8xf32>
    %49 = vector.broadcast %44 : vector<1x8xf32> to vector<8x8xf32>
    %50 = arith.addf %48, %49 : vector<8x8xf32>
    %cst_19 = arith.constant dense<0xFF800000> : vector<8xf32>
    %51 = vector.multi_reduction <maximumf>, %50, %cst_19 [1] : vector<8x8xf32> to vector<8xf32>
    %52 = vector.shape_cast %51 : vector<8xf32> to vector<8x1xf32>
    %53 = vector.broadcast %52 : vector<8x1xf32> to vector<8x8xf32>
    %54 = arith.subf %50, %53 : vector<8x8xf32>
    %55 = math.exp %54 : vector<8x8xf32>
    %cst_20 = arith.constant dense<0.000000e+00> : vector<8xf32>
    %56 = vector.multi_reduction <add>, %55, %cst_20 [1] : vector<8x8xf32> to vector<8xf32>
    %57 = vector.shape_cast %56 : vector<8xf32> to vector<8x1xf32>
    %58 = tpu.reciprocal %57 {approx = true} : vector<8x1xf32> -> vector<8x1xf32>
    %59 = vector.broadcast %58 : vector<8x1xf32> to vector<8x8xf32>
    %60 = arith.mulf %55, %59 : vector<8x8xf32>
    %cst_21 = arith.constant dense<0.000000e+00> : vector<8x16xf32>
    %61 = tpu.matmul %60, %47, %cst_21 {dimension_numbers = #tpu.dot_dimension_numbers<[1], [0], [0], [1], [0, 0, 1, 1], [], []>} : vector<8x8xf32>, vector<8x16xf32>, vector<8x16xf32> -> vector<8x16xf32>
    %62 = vector.extract_strided_slice %43 {offsets = [0, 48], sizes = [8, 16], strides = [1, 1]} : vector<8x96xf32> to vector<8x16xf32>
    %63 = vector.extract_strided_slice %43 {offsets = [0, 64], sizes = [8, 16], strides = [1, 1]} : vector<8x96xf32> to vector<8x16xf32>
    %64 = vector.extract_strided_slice %43 {offsets = [0, 80], sizes = [8, 16], strides = [1, 1]} : vector<8x96xf32> to vector<8x16xf32>
    %cst_22 = arith.constant dense<0.000000e+00> : vector<8x8xf32>
    %65 = tpu.matmul %62, %63, %cst_22 {dimension_numbers = #tpu.dot_dimension_numbers<[1], [1], [0], [0], [0, 0, 1, 0], [], []>} : vector<8x16xf32>, vector<8x16xf32>, vector<8x8xf32> -> vector<8x8xf32>
    %66 = vector.broadcast %44 : vector<1x8xf32> to vector<8x8xf32>
    %67 = arith.addf %65, %66 : vector<8x8xf32>
    %cst_23 = arith.constant dense<0xFF800000> : vector<8xf32>
    %68 = vector.multi_reduction <maximumf>, %67, %cst_23 [1] : vector<8x8xf32> to vector<8xf32>
    %69 = vector.shape_cast %68 : vector<8xf32> to vector<8x1xf32>
    %70 = vector.broadcast %69 : vector<8x1xf32> to vector<8x8xf32>
    %71 = arith.subf %67, %70 : vector<8x8xf32>
    %72 = math.exp %71 : vector<8x8xf32>
    %cst_24 = arith.constant dense<0.000000e+00> : vector<8xf32>
    %73 = vector.multi_reduction <add>, %72, %cst_24 [1] : vector<8x8xf32> to vector<8xf32>
    %74 = vector.shape_cast %73 : vector<8xf32> to vector<8x1xf32>
    %75 = tpu.reciprocal %74 {approx = true} : vector<8x1xf32> -> vector<8x1xf32>
    %76 = vector.broadcast %75 : vector<8x1xf32> to vector<8x8xf32>
    %77 = arith.mulf %72, %76 : vector<8x8xf32>
    %cst_25 = arith.constant dense<0.000000e+00> : vector<8x16xf32>
    %78 = tpu.matmul %77, %64, %cst_25 {dimension_numbers = #tpu.dot_dimension_numbers<[1], [0], [0], [1], [0, 0, 1, 1], [], []>} : vector<8x8xf32>, vector<8x16xf32>, vector<8x16xf32> -> vector<8x16xf32>
    %79 = tpu.concatenate %61, %78 in 1 : vector<8x16xf32>, vector<8x16xf32> -> vector<8x32xf32>
    %80 = vector.extract_strided_slice %42 {offsets = [8, 0], sizes = [8, 96], strides = [1, 1]} : vector<16x96xf32> to vector<8x96xf32>
    %81 = vector.extract_strided_slice %1 {offsets = [1, 0], sizes = [1, 8], strides = [1, 1]} : vector<2x8xf32> to vector<1x8xf32>
    %82 = vector.extract_strided_slice %80 {offsets = [0, 0], sizes = [8, 16], strides = [1, 1]} : vector<8x96xf32> to vector<8x16xf32>
    %83 = vector.extract_strided_slice %80 {offsets = [0, 16], sizes = [8, 16], strides = [1, 1]} : vector<8x96xf32> to vector<8x16xf32>
    %84 = vector.extract_strided_slice %80 {offsets = [0, 32], sizes = [8, 16], strides = [1, 1]} : vector<8x96xf32> to vector<8x16xf32>
    %cst_26 = arith.constant dense<0.000000e+00> : vector<8x8xf32>
    %85 = tpu.matmul %82, %83, %cst_26 {dimension_numbers = #tpu.dot_dimension_numbers<[1], [1], [0], [0], [0, 0, 1, 0], [], []>} : vector<8x16xf32>, vector<8x16xf32>, vector<8x8xf32> -> vector<8x8xf32>
    %86 = vector.broadcast %81 : vector<1x8xf32> to vector<8x8xf32>
    %87 = arith.addf %85, %86 : vector<8x8xf32>
    %cst_27 = arith.constant dense<0xFF800000> : vector<8xf32>
    %88 = vector.multi_reduction <maximumf>, %87, %cst_27 [1] : vector<8x8xf32> to vector<8xf32>
    %89 = vector.shape_cast %88 : vector<8xf32> to vector<8x1xf32>
    %90 = vector.broadcast %89 : vector<8x1xf32> to vector<8x8xf32>
    %91 = arith.subf %87, %90 : vector<8x8xf32>
    %92 = math.exp %91 : vector<8x8xf32>
    %cst_28 = arith.constant dense<0.000000e+00> : vector<8xf32>
    %93 = vector.multi_reduction <add>, %92, %cst_28 [1] : vector<8x8xf32> to vector<8xf32>
    %94 = vector.shape_cast %93 : vector<8xf32> to vector<8x1xf32>
    %95 = tpu.reciprocal %94 {approx = true} : vector<8x1xf32> -> vector<8x1xf32>
    %96 = vector.broadcast %95 : vector<8x1xf32> to vector<8x8xf32>
    %97 = arith.mulf %92, %96 : vector<8x8xf32>
    %cst_29 = arith.constant dense<0.000000e+00> : vector<8x16xf32>
    %98 = tpu.matmul %97, %84, %cst_29 {dimension_numbers = #tpu.dot_dimension_numbers<[1], [0], [0], [1], [0, 0, 1, 1], [], []>} : vector<8x8xf32>, vector<8x16xf32>, vector<8x16xf32> -> vector<8x16xf32>
    %99 = vector.extract_strided_slice %80 {offsets = [0, 48], sizes = [8, 16], strides = [1, 1]} : vector<8x96xf32> to vector<8x16xf32>
    %100 = vector.extract_strided_slice %80 {offsets = [0, 64], sizes = [8, 16], strides = [1, 1]} : vector<8x96xf32> to vector<8x16xf32>
    %101 = vector.extract_strided_slice %80 {offsets = [0, 80], sizes = [8, 16], strides = [1, 1]} : vector<8x96xf32> to vector<8x16xf32>
    %cst_30 = arith.constant dense<0.000000e+00> : vector<8x8xf32>
    %102 = tpu.matmul %99, %100, %cst_30 {dimension_numbers = #tpu.dot_dimension_numbers<[1], [1], [0], [0], [0, 0, 1, 0], [], []>} : vector<8x16xf32>, vector<8x16xf32>, vector<8x8xf32> -> vector<8x8xf32>
    %103 = vector.broadcast %81 : vector<1x8xf32> to vector<8x8xf32>
    %104 = arith.addf %102, %103 : vector<8x8xf32>
    %cst_31 = arith.constant dense<0xFF800000> : vector<8xf32>
    %105 = vector.multi_reduction <maximumf>, %104, %cst_31 [1] : vector<8x8xf32> to vector<8xf32>
    %106 = vector.shape_cast %105 : vector<8xf32> to vector<8x1xf32>
    %107 = vector.broadcast %106 : vector<8x1xf32> to vector<8x8xf32>
    %108 = arith.subf %104, %107 : vector<8x8xf32>
    %109 = math.exp %108 : vector<8x8xf32>
    %cst_32 = arith.constant dense<0.000000e+00> : vector<8xf32>
    %110 = vector.multi_reduction <add>, %109, %cst_32 [1] : vector<8x8xf32> to vector<8xf32>
    %111 = vector.shape_cast %110 : vector<8xf32> to vector<8x1xf32>
    %112 = tpu.reciprocal %111 {approx = true} : vector<8x1xf32> -> vector<8x1xf32>
    %113 = vector.broadcast %112 : vector<8x1xf32> to vector<8x8xf32>
    %114 = arith.mulf %109, %113 : vector<8x8xf32>
    %cst_33 = arith.constant dense<0.000000e+00> : vector<8x16xf32>
    %115 = tpu.matmul %114, %101, %cst_33 {dimension_numbers = #tpu.dot_dimension_numbers<[1], [0], [0], [1], [0, 0, 1, 1], [], []>} : vector<8x8xf32>, vector<8x16xf32>, vector<8x16xf32> -> vector<8x16xf32>
    %116 = tpu.concatenate %98, %115 in 1 : vector<8x16xf32>, vector<8x16xf32> -> vector<8x32xf32>
    %117 = tpu.concatenate %79, %116 in 0 : vector<8x32xf32>, vector<8x32xf32> -> vector<16x32xf32>
    %118 = arith.truncf %117 : vector<16x32xf32> to vector<16x32xbf16>
    %cst_34 = arith.constant dense<0.000000e+00> : vector<16x32xf32>
    %119 = tpu.matmul %118, %28, %cst_34 {dimension_numbers = #tpu.dot_dimension_numbers<[1], [0], [0], [1], [0, 0, 1, 1], [], []>} : vector<16x32xbf16>, vector<32x32xbf16>, vector<16x32xf32> -> vector<16x32xf32>
    %120 = vector.broadcast %32 : vector<1x32xf32> to vector<16x32xf32>
    %121 = arith.addf %119, %120 : vector<16x32xf32>
    %122 = arith.addf %26, %121 : vector<16x32xf32>
    %cst_35 = arith.constant dense<0.000000e+00> : vector<16xf32>
    %123 = vector.multi_reduction <add>, %122, %cst_35 [1] : vector<16x32xf32> to vector<16xf32>
    %124 = vector.shape_cast %123 : vector<16xf32> to vector<16x1xf32>
    %cst_36 = arith.constant 3.200000e+01 : f32
    %125 = vector.broadcast %cst_36 : f32 to vector<16x1xf32>
    %126 = arith.divf %124, %125 : vector<16x1xf32>
    %127 = vector.broadcast %126 : vector<16x1xf32> to vector<16x32xf32>
    %128 = arith.subf %122, %127 : vector<16x32xf32>
    %129 = arith.mulf %128, %128 : vector<16x32xf32>
    %cst_37 = arith.constant dense<0.000000e+00> : vector<16xf32>
    %130 = vector.multi_reduction <add>, %129, %cst_37 [1] : vector<16x32xf32> to vector<16xf32>
    %131 = vector.shape_cast %130 : vector<16xf32> to vector<16x1xf32>
    %cst_38 = arith.constant 3.200000e+01 : f32
    %132 = vector.broadcast %cst_38 : f32 to vector<16x1xf32>
    %133 = arith.divf %131, %132 : vector<16x1xf32>
    %134 = vector.broadcast %126 : vector<16x1xf32> to vector<16x32xf32>
    %135 = arith.subf %122, %134 : vector<16x32xf32>
    %cst_39 = arith.constant 9.99999996E-13 : f32
    %136 = vector.broadcast %cst_39 : f32 to vector<16x1xf32>
    %137 = arith.addf %133, %136 : vector<16x1xf32>
    %138 = math.rsqrt %137 : vector<16x1xf32>
    %139 = vector.broadcast %138 : vector<16x1xf32> to vector<16x32xf32>
    %140 = arith.mulf %135, %139 : vector<16x32xf32>
    %141 = vector.broadcast %33 : vector<1x32xf32> to vector<16x32xf32>
    %142 = arith.mulf %140, %141 : vector<16x32xf32>
    %143 = vector.broadcast %34 : vector<1x32xf32> to vector<16x32xf32>
    %144 = arith.addf %142, %143 : vector<16x32xf32>
    %145 = arith.truncf %144 : vector<16x32xf32> to vector<16x32xbf16>
    %cst_40 = arith.constant dense<0.000000e+00> : vector<16x64xf32>
    %146 = tpu.matmul %145, %29, %cst_40 {dimension_numbers = #tpu.dot_dimension_numbers<[1], [0], [0], [1], [0, 0, 1, 1], [], []>} : vector<16x32xbf16>, vector<32x64xbf16>, vector<16x64xf32> -> vector<16x64xf32>
    %147 = vector.broadcast %35 : vector<1x64xf32> to vector<16x64xf32>
    %148 = arith.addf %146, %147 : vector<16x64xf32>
    %149 = arith.mulf %148, %148 : vector<16x64xf32>
    %150 = arith.mulf %148, %149 : vector<16x64xf32>
    %cst_41 = arith.constant 4.471500e-02 : f32
    %151 = vector.broadcast %cst_41 : f32 to vector<16x64xf32>
    %152 = arith.mulf %151, %150 : vector<16x64xf32>
    %153 = arith.addf %148, %152 : vector<16x64xf32>
    %cst_42 = arith.constant 0.797884583 : f32
    %154 = vector.broadcast %cst_42 : f32 to vector<16x64xf32>
    %155 = arith.mulf %154, %153 : vector<16x64xf32>
    %156 = math.tanh %155 : vector<16x64xf32>
    %cst_43 = arith.constant 1.000000e+00 : f32
    %157 = vector.broadcast %cst_43 : f32 to vector<16x64xf32>
    %158 = arith.addf %157, %156 : vector<16x64xf32>
    %cst_44 = arith.constant 5.000000e-01 : f32
    %159 = vector.broadcast %cst_44 : f32 to vector<16x64xf32>
    %160 = arith.mulf %159, %158 : vector<16x64xf32>
    %161 = arith.mulf %148, %160 : vector<16x64xf32>
    %162 = arith.truncf %161 : vector<16x64xf32> to vector<16x64xbf16>
    %cst_45 = arith.constant dense<0.000000e+00> : vector<16x32xf32>
    %163 = tpu.matmul %162, %30, %cst_45 {dimension_numbers = #tpu.dot_dimension_numbers<[1], [0], [0], [1], [0, 0, 1, 1], [], []>} : vector<16x64xbf16>, vector<64x32xbf16>, vector<16x32xf32> -> vector<16x32xf32>
    %164 = vector.broadcast %36 : vector<1x32xf32> to vector<16x32xf32>
    %165 = arith.addf %163, %164 : vector<16x32xf32>
    %166 = arith.addf %144, %165 : vector<16x32xf32>
    %cst_46 = arith.constant dense<0.000000e+00> : vector<16xf32>
    %167 = vector.multi_reduction <add>, %166, %cst_46 [1] : vector<16x32xf32> to vector<16xf32>
    %168 = vector.shape_cast %167 : vector<16xf32> to vector<16x1xf32>
    %cst_47 = arith.constant 3.200000e+01 : f32
    %169 = vector.broadcast %cst_47 : f32 to vector<16x1xf32>
    %170 = arith.divf %168, %169 : vector<16x1xf32>
    %171 = vector.broadcast %170 : vector<16x1xf32> to vector<16x32xf32>
    %172 = arith.subf %166, %171 : vector<16x32xf32>
    %173 = arith.mulf %172, %172 : vector<16x32xf32>
    %cst_48 = arith.constant dense<0.000000e+00> : vector<16xf32>
    %174 = vector.multi_reduction <add>, %173, %cst_48 [1] : vector<16x32xf32> to vector<16xf32>
    %175 = vector.shape_cast %174 : vector<16xf32> to vector<16x1xf32>
    %cst_49 = arith.constant 3.200000e+01 : f32
    %176 = vector.broadcast %cst_49 : f32 to vector<16x1xf32>
    %177 = arith.divf %175, %176 : vector<16x1xf32>
    %178 = vector.broadcast %170 : vector<16x1xf32> to vector<16x32xf32>
    %179 = arith.subf %166, %178 : vector<16x32xf32>
    %cst_50 = arith.constant 9.99999996E-13 : f32
    %180 = vector.broadcast %cst_50 : f32 to vector<16x1xf32>
    %181 = arith.addf %177, %180 : vector<16x1xf32>
    %182 = math.rsqrt %181 : vector<16x1xf32>
    %183 = vector.broadcast %182 : vector<16x1xf32> to vector<16x32xf32>
    %184 = arith.mulf %179, %183 : vector<16x32xf32>
    %185 = vector.broadcast %37 : vector<1x32xf32> to vector<16x32xf32>
    %186 = arith.mulf %184, %185 : vector<16x32xf32>
    %187 = vector.broadcast %38 : vector<1x32xf32> to vector<16x32xf32>
    %188 = arith.addf %186, %187 : vector<16x32xf32>
    %c32 = arith.constant 32 : index
    %c0_51 = arith.constant 0 : index
    %189 = vector.load %arg2[%c32, %c0_51] : memref<64x96xbf16, #tpu.memory_space<vmem>>, vector<32x96xbf16>
    %c32_52 = arith.constant 32 : index
    %c0_53 = arith.constant 0 : index
    %190 = vector.load %arg3[%c32_52, %c0_53] : memref<64x32xbf16, #tpu.memory_space<vmem>>, vector<32x32xbf16>
    %c32_54 = arith.constant 32 : index
    %c0_55 = arith.constant 0 : index
    %191 = vector.load %arg4[%c32_54, %c0_55] : memref<64x64xbf16, #tpu.memory_space<vmem>>, vector<32x64xbf16>
    %c64 = arith.constant 64 : index
    %c0_56 = arith.constant 0 : index
    %192 = vector.load %arg5[%c64, %c0_56] : memref<128x32xbf16, #tpu.memory_space<vmem>>, vector<64x32xbf16>
    %193 = vector.extract_strided_slice %0 {offsets = [10, 0], sizes = [1, 96], strides = [1, 1]} : vector<20x128xf32> to vector<1x96xf32>
    %194 = vector.extract_strided_slice %0 {offsets = [11, 0], sizes = [1, 32], strides = [1, 1]} : vector<20x128xf32> to vector<1x32xf32>
    %195 = vector.extract_strided_slice %0 {offsets = [12, 0], sizes = [1, 32], strides = [1, 1]} : vector<20x128xf32> to vector<1x32xf32>
    %196 = vector.extract_strided_slice %0 {offsets = [13, 0], sizes = [1, 32], strides = [1, 1]} : vector<20x128xf32> to vector<1x32xf32>
    %197 = vector.extract_strided_slice %0 {offsets = [14, 0], sizes = [1, 64], strides = [1, 1]} : vector<20x128xf32> to vector<1x64xf32>
    %198 = vector.extract_strided_slice %0 {offsets = [15, 0], sizes = [1, 32], strides = [1, 1]} : vector<20x128xf32> to vector<1x32xf32>
    %199 = vector.extract_strided_slice %0 {offsets = [16, 0], sizes = [1, 32], strides = [1, 1]} : vector<20x128xf32> to vector<1x32xf32>
    %200 = vector.extract_strided_slice %0 {offsets = [17, 0], sizes = [1, 32], strides = [1, 1]} : vector<20x128xf32> to vector<1x32xf32>
    %201 = arith.truncf %188 : vector<16x32xf32> to vector<16x32xbf16>
    %cst_57 = arith.constant dense<0.000000e+00> : vector<16x96xf32>
    %202 = tpu.matmul %201, %189, %cst_57 {dimension_numbers = #tpu.dot_dimension_numbers<[1], [0], [0], [1], [0, 0, 1, 1], [], []>} : vector<16x32xbf16>, vector<32x96xbf16>, vector<16x96xf32> -> vector<16x96xf32>
    %203 = vector.broadcast %193 : vector<1x96xf32> to vector<16x96xf32>
    %204 = arith.addf %202, %203 : vector<16x96xf32>
    %205 = vector.extract_strided_slice %204 {offsets = [0, 0], sizes = [8, 96], strides = [1, 1]} : vector<16x96xf32> to vector<8x96xf32>
    %206 = vector.extract_strided_slice %1 {offsets = [0, 0], sizes = [1, 8], strides = [1, 1]} : vector<2x8xf32> to vector<1x8xf32>
    %207 = vector.extract_strided_slice %205 {offsets = [0, 0], sizes = [8, 16], strides = [1, 1]} : vector<8x96xf32> to vector<8x16xf32>
    %208 = vector.extract_strided_slice %205 {offsets = [0, 16], sizes = [8, 16], strides = [1, 1]} : vector<8x96xf32> to vector<8x16xf32>
    %209 = vector.extract_strided_slice %205 {offsets = [0, 32], sizes = [8, 16], strides = [1, 1]} : vector<8x96xf32> to vector<8x16xf32>
    %cst_58 = arith.constant dense<0.000000e+00> : vector<8x8xf32>
    %210 = tpu.matmul %207, %208, %cst_58 {dimension_numbers = #tpu.dot_dimension_numbers<[1], [1], [0], [0], [0, 0, 1, 0], [], []>} : vector<8x16xf32>, vector<8x16xf32>, vector<8x8xf32> -> vector<8x8xf32>
    %211 = vector.broadcast %206 : vector<1x8xf32> to vector<8x8xf32>
    %212 = arith.addf %210, %211 : vector<8x8xf32>
    %cst_59 = arith.constant dense<0xFF800000> : vector<8xf32>
    %213 = vector.multi_reduction <maximumf>, %212, %cst_59 [1] : vector<8x8xf32> to vector<8xf32>
    %214 = vector.shape_cast %213 : vector<8xf32> to vector<8x1xf32>
    %215 = vector.broadcast %214 : vector<8x1xf32> to vector<8x8xf32>
    %216 = arith.subf %212, %215 : vector<8x8xf32>
    %217 = math.exp %216 : vector<8x8xf32>
    %cst_60 = arith.constant dense<0.000000e+00> : vector<8xf32>
    %218 = vector.multi_reduction <add>, %217, %cst_60 [1] : vector<8x8xf32> to vector<8xf32>
    %219 = vector.shape_cast %218 : vector<8xf32> to vector<8x1xf32>
    %220 = tpu.reciprocal %219 {approx = true} : vector<8x1xf32> -> vector<8x1xf32>
    %221 = vector.broadcast %220 : vector<8x1xf32> to vector<8x8xf32>
    %222 = arith.mulf %217, %221 : vector<8x8xf32>
    %cst_61 = arith.constant dense<0.000000e+00> : vector<8x16xf32>
    %223 = tpu.matmul %222, %209, %cst_61 {dimension_numbers = #tpu.dot_dimension_numbers<[1], [0], [0], [1], [0, 0, 1, 1], [], []>} : vector<8x8xf32>, vector<8x16xf32>, vector<8x16xf32> -> vector<8x16xf32>
    %224 = vector.extract_strided_slice %205 {offsets = [0, 48], sizes = [8, 16], strides = [1, 1]} : vector<8x96xf32> to vector<8x16xf32>
    %225 = vector.extract_strided_slice %205 {offsets = [0, 64], sizes = [8, 16], strides = [1, 1]} : vector<8x96xf32> to vector<8x16xf32>
    %226 = vector.extract_strided_slice %205 {offsets = [0, 80], sizes = [8, 16], strides = [1, 1]} : vector<8x96xf32> to vector<8x16xf32>
    %cst_62 = arith.constant dense<0.000000e+00> : vector<8x8xf32>
    %227 = tpu.matmul %224, %225, %cst_62 {dimension_numbers = #tpu.dot_dimension_numbers<[1], [1], [0], [0], [0, 0, 1, 0], [], []>} : vector<8x16xf32>, vector<8x16xf32>, vector<8x8xf32> -> vector<8x8xf32>
    %228 = vector.broadcast %206 : vector<1x8xf32> to vector<8x8xf32>
    %229 = arith.addf %227, %228 : vector<8x8xf32>
    %cst_63 = arith.constant dense<0xFF800000> : vector<8xf32>
    %230 = vector.multi_reduction <maximumf>, %229, %cst_63 [1] : vector<8x8xf32> to vector<8xf32>
    %231 = vector.shape_cast %230 : vector<8xf32> to vector<8x1xf32>
    %232 = vector.broadcast %231 : vector<8x1xf32> to vector<8x8xf32>
    %233 = arith.subf %229, %232 : vector<8x8xf32>
    %234 = math.exp %233 : vector<8x8xf32>
    %cst_64 = arith.constant dense<0.000000e+00> : vector<8xf32>
    %235 = vector.multi_reduction <add>, %234, %cst_64 [1] : vector<8x8xf32> to vector<8xf32>
    %236 = vector.shape_cast %235 : vector<8xf32> to vector<8x1xf32>
    %237 = tpu.reciprocal %236 {approx = true} : vector<8x1xf32> -> vector<8x1xf32>
    %238 = vector.broadcast %237 : vector<8x1xf32> to vector<8x8xf32>
    %239 = arith.mulf %234, %238 : vector<8x8xf32>
    %cst_65 = arith.constant dense<0.000000e+00> : vector<8x16xf32>
    %240 = tpu.matmul %239, %226, %cst_65 {dimension_numbers = #tpu.dot_dimension_numbers<[1], [0], [0], [1], [0, 0, 1, 1], [], []>} : vector<8x8xf32>, vector<8x16xf32>, vector<8x16xf32> -> vector<8x16xf32>
    %241 = tpu.concatenate %223, %240 in 1 : vector<8x16xf32>, vector<8x16xf32> -> vector<8x32xf32>
    %242 = vector.extract_strided_slice %204 {offsets = [8, 0], sizes = [8, 96], strides = [1, 1]} : vector<16x96xf32> to vector<8x96xf32>
    %243 = vector.extract_strided_slice %1 {offsets = [1, 0], sizes = [1, 8], strides = [1, 1]} : vector<2x8xf32> to vector<1x8xf32>
    %244 = vector.extract_strided_slice %242 {offsets = [0, 0], sizes = [8, 16], strides = [1, 1]} : vector<8x96xf32> to vector<8x16xf32>
    %245 = vector.extract_strided_slice %242 {offsets = [0, 16], sizes = [8, 16], strides = [1, 1]} : vector<8x96xf32> to vector<8x16xf32>
    %246 = vector.extract_strided_slice %242 {offsets = [0, 32], sizes = [8, 16], strides = [1, 1]} : vector<8x96xf32> to vector<8x16xf32>
    %cst_66 = arith.constant dense<0.000000e+00> : vector<8x8xf32>
    %247 = tpu.matmul %244, %245, %cst_66 {dimension_numbers = #tpu.dot_dimension_numbers<[1], [1], [0], [0], [0, 0, 1, 0], [], []>} : vector<8x16xf32>, vector<8x16xf32>, vector<8x8xf32> -> vector<8x8xf32>
    %248 = vector.broadcast %243 : vector<1x8xf32> to vector<8x8xf32>
    %249 = arith.addf %247, %248 : vector<8x8xf32>
    %cst_67 = arith.constant dense<0xFF800000> : vector<8xf32>
    %250 = vector.multi_reduction <maximumf>, %249, %cst_67 [1] : vector<8x8xf32> to vector<8xf32>
    %251 = vector.shape_cast %250 : vector<8xf32> to vector<8x1xf32>
    %252 = vector.broadcast %251 : vector<8x1xf32> to vector<8x8xf32>
    %253 = arith.subf %249, %252 : vector<8x8xf32>
    %254 = math.exp %253 : vector<8x8xf32>
    %cst_68 = arith.constant dense<0.000000e+00> : vector<8xf32>
    %255 = vector.multi_reduction <add>, %254, %cst_68 [1] : vector<8x8xf32> to vector<8xf32>
    %256 = vector.shape_cast %255 : vector<8xf32> to vector<8x1xf32>
    %257 = tpu.reciprocal %256 {approx = true} : vector<8x1xf32> -> vector<8x1xf32>
    %258 = vector.broadcast %257 : vector<8x1xf32> to vector<8x8xf32>
    %259 = arith.mulf %254, %258 : vector<8x8xf32>
    %cst_69 = arith.constant dense<0.000000e+00> : vector<8x16xf32>
    %260 = tpu.matmul %259, %246, %cst_69 {dimension_numbers = #tpu.dot_dimension_numbers<[1], [0], [0], [1], [0, 0, 1, 1], [], []>} : vector<8x8xf32>, vector<8x16xf32>, vector<8x16xf32> -> vector<8x16xf32>
    %261 = vector.extract_strided_slice %242 {offsets = [0, 48], sizes = [8, 16], strides = [1, 1]} : vector<8x96xf32> to vector<8x16xf32>
    %262 = vector.extract_strided_slice %242 {offsets = [0, 64], sizes = [8, 16], strides = [1, 1]} : vector<8x96xf32> to vector<8x16xf32>
    %263 = vector.extract_strided_slice %242 {offsets = [0, 80], sizes = [8, 16], strides = [1, 1]} : vector<8x96xf32> to vector<8x16xf32>
    %cst_70 = arith.constant dense<0.000000e+00> : vector<8x8xf32>
    %264 = tpu.matmul %261, %262, %cst_70 {dimension_numbers = #tpu.dot_dimension_numbers<[1], [1], [0], [0], [0, 0, 1, 0], [], []>} : vector<8x16xf32>, vector<8x16xf32>, vector<8x8xf32> -> vector<8x8xf32>
    %265 = vector.broadcast %243 : vector<1x8xf32> to vector<8x8xf32>
    %266 = arith.addf %264, %265 : vector<8x8xf32>
    %cst_71 = arith.constant dense<0xFF800000> : vector<8xf32>
    %267 = vector.multi_reduction <maximumf>, %266, %cst_71 [1] : vector<8x8xf32> to vector<8xf32>
    %268 = vector.shape_cast %267 : vector<8xf32> to vector<8x1xf32>
    %269 = vector.broadcast %268 : vector<8x1xf32> to vector<8x8xf32>
    %270 = arith.subf %266, %269 : vector<8x8xf32>
    %271 = math.exp %270 : vector<8x8xf32>
    %cst_72 = arith.constant dense<0.000000e+00> : vector<8xf32>
    %272 = vector.multi_reduction <add>, %271, %cst_72 [1] : vector<8x8xf32> to vector<8xf32>
    %273 = vector.shape_cast %272 : vector<8xf32> to vector<8x1xf32>
    %274 = tpu.reciprocal %273 {approx = true} : vector<8x1xf32> -> vector<8x1xf32>
    %275 = vector.broadcast %274 : vector<8x1xf32> to vector<8x8xf32>
    %276 = arith.mulf %271, %275 : vector<8x8xf32>
    %cst_73 = arith.constant dense<0.000000e+00> : vector<8x16xf32>
    %277 = tpu.matmul %276, %263, %cst_73 {dimension_numbers = #tpu.dot_dimension_numbers<[1], [0], [0], [1], [0, 0, 1, 1], [], []>} : vector<8x8xf32>, vector<8x16xf32>, vector<8x16xf32> -> vector<8x16xf32>
    %278 = tpu.concatenate %260, %277 in 1 : vector<8x16xf32>, vector<8x16xf32> -> vector<8x32xf32>
    %279 = tpu.concatenate %241, %278 in 0 : vector<8x32xf32>, vector<8x32xf32> -> vector<16x32xf32>
    %280 = arith.truncf %279 : vector<16x32xf32> to vector<16x32xbf16>
    %cst_74 = arith.constant dense<0.000000e+00> : vector<16x32xf32>
    %281 = tpu.matmul %280, %190, %cst_74 {dimension_numbers = #tpu.dot_dimension_numbers<[1], [0], [0], [1], [0, 0, 1, 1], [], []>} : vector<16x32xbf16>, vector<32x32xbf16>, vector<16x32xf32> -> vector<16x32xf32>
    %282 = vector.broadcast %194 : vector<1x32xf32> to vector<16x32xf32>
    %283 = arith.addf %281, %282 : vector<16x32xf32>
    %284 = arith.addf %188, %283 : vector<16x32xf32>
    %cst_75 = arith.constant dense<0.000000e+00> : vector<16xf32>
    %285 = vector.multi_reduction <add>, %284, %cst_75 [1] : vector<16x32xf32> to vector<16xf32>
    %286 = vector.shape_cast %285 : vector<16xf32> to vector<16x1xf32>
    %cst_76 = arith.constant 3.200000e+01 : f32
    %287 = vector.broadcast %cst_76 : f32 to vector<16x1xf32>
    %288 = arith.divf %286, %287 : vector<16x1xf32>
    %289 = vector.broadcast %288 : vector<16x1xf32> to vector<16x32xf32>
    %290 = arith.subf %284, %289 : vector<16x32xf32>
    %291 = arith.mulf %290, %290 : vector<16x32xf32>
    %cst_77 = arith.constant dense<0.000000e+00> : vector<16xf32>
    %292 = vector.multi_reduction <add>, %291, %cst_77 [1] : vector<16x32xf32> to vector<16xf32>
    %293 = vector.shape_cast %292 : vector<16xf32> to vector<16x1xf32>
    %cst_78 = arith.constant 3.200000e+01 : f32
    %294 = vector.broadcast %cst_78 : f32 to vector<16x1xf32>
    %295 = arith.divf %293, %294 : vector<16x1xf32>
    %296 = vector.broadcast %288 : vector<16x1xf32> to vector<16x32xf32>
    %297 = arith.subf %284, %296 : vector<16x32xf32>
    %cst_79 = arith.constant 9.99999996E-13 : f32
    %298 = vector.broadcast %cst_79 : f32 to vector<16x1xf32>
    %299 = arith.addf %295, %298 : vector<16x1xf32>
    %300 = math.rsqrt %299 : vector<16x1xf32>
    %301 = vector.broadcast %300 : vector<16x1xf32> to vector<16x32xf32>
    %302 = arith.mulf %297, %301 : vector<16x32xf32>
    %303 = vector.broadcast %195 : vector<1x32xf32> to vector<16x32xf32>
    %304 = arith.mulf %302, %303 : vector<16x32xf32>
    %305 = vector.broadcast %196 : vector<1x32xf32> to vector<16x32xf32>
    %306 = arith.addf %304, %305 : vector<16x32xf32>
    %307 = arith.truncf %306 : vector<16x32xf32> to vector<16x32xbf16>
    %cst_80 = arith.constant dense<0.000000e+00> : vector<16x64xf32>
    %308 = tpu.matmul %307, %191, %cst_80 {dimension_numbers = #tpu.dot_dimension_numbers<[1], [0], [0], [1], [0, 0, 1, 1], [], []>} : vector<16x32xbf16>, vector<32x64xbf16>, vector<16x64xf32> -> vector<16x64xf32>
    %309 = vector.broadcast %197 : vector<1x64xf32> to vector<16x64xf32>
    %310 = arith.addf %308, %309 : vector<16x64xf32>
    %311 = arith.mulf %310, %310 : vector<16x64xf32>
    %312 = arith.mulf %310, %311 : vector<16x64xf32>
    %cst_81 = arith.constant 4.471500e-02 : f32
    %313 = vector.broadcast %cst_81 : f32 to vector<16x64xf32>
    %314 = arith.mulf %313, %312 : vector<16x64xf32>
    %315 = arith.addf %310, %314 : vector<16x64xf32>
    %cst_82 = arith.constant 0.797884583 : f32
    %316 = vector.broadcast %cst_82 : f32 to vector<16x64xf32>
    %317 = arith.mulf %316, %315 : vector<16x64xf32>
    %318 = math.tanh %317 : vector<16x64xf32>
    %cst_83 = arith.constant 1.000000e+00 : f32
    %319 = vector.broadcast %cst_83 : f32 to vector<16x64xf32>
    %320 = arith.addf %319, %318 : vector<16x64xf32>
    %cst_84 = arith.constant 5.000000e-01 : f32
    %321 = vector.broadcast %cst_84 : f32 to vector<16x64xf32>
    %322 = arith.mulf %321, %320 : vector<16x64xf32>
    %323 = arith.mulf %310, %322 : vector<16x64xf32>
    %324 = arith.truncf %323 : vector<16x64xf32> to vector<16x64xbf16>
    %cst_85 = arith.constant dense<0.000000e+00> : vector<16x32xf32>
    %325 = tpu.matmul %324, %192, %cst_85 {dimension_numbers = #tpu.dot_dimension_numbers<[1], [0], [0], [1], [0, 0, 1, 1], [], []>} : vector<16x64xbf16>, vector<64x32xbf16>, vector<16x32xf32> -> vector<16x32xf32>
    %326 = vector.broadcast %198 : vector<1x32xf32> to vector<16x32xf32>
    %327 = arith.addf %325, %326 : vector<16x32xf32>
    %328 = arith.addf %306, %327 : vector<16x32xf32>
    %cst_86 = arith.constant dense<0.000000e+00> : vector<16xf32>
    %329 = vector.multi_reduction <add>, %328, %cst_86 [1] : vector<16x32xf32> to vector<16xf32>
    %330 = vector.shape_cast %329 : vector<16xf32> to vector<16x1xf32>
    %cst_87 = arith.constant 3.200000e+01 : f32
    %331 = vector.broadcast %cst_87 : f32 to vector<16x1xf32>
    %332 = arith.divf %330, %331 : vector<16x1xf32>
    %333 = vector.broadcast %332 : vector<16x1xf32> to vector<16x32xf32>
    %334 = arith.subf %328, %333 : vector<16x32xf32>
    %335 = arith.mulf %334, %334 : vector<16x32xf32>
    %cst_88 = arith.constant dense<0.000000e+00> : vector<16xf32>
    %336 = vector.multi_reduction <add>, %335, %cst_88 [1] : vector<16x32xf32> to vector<16xf32>
    %337 = vector.shape_cast %336 : vector<16xf32> to vector<16x1xf32>
    %cst_89 = arith.constant 3.200000e+01 : f32
    %338 = vector.broadcast %cst_89 : f32 to vector<16x1xf32>
    %339 = arith.divf %337, %338 : vector<16x1xf32>
    %340 = vector.broadcast %332 : vector<16x1xf32> to vector<16x32xf32>
    %341 = arith.subf %328, %340 : vector<16x32xf32>
    %cst_90 = arith.constant 9.99999996E-13 : f32
    %342 = vector.broadcast %cst_90 : f32 to vector<16x1xf32>
    %343 = arith.addf %339, %342 : vector<16x1xf32>
    %344 = math.rsqrt %343 : vector<16x1xf32>
    %345 = vector.broadcast %344 : vector<16x1xf32> to vector<16x32xf32>
    %346 = arith.mulf %341, %345 : vector<16x32xf32>
    %347 = vector.broadcast %199 : vector<1x32xf32> to vector<16x32xf32>
    %348 = arith.mulf %346, %347 : vector<16x32xf32>
    %349 = vector.broadcast %200 : vector<1x32xf32> to vector<16x32xf32>
    %350 = arith.addf %348, %349 : vector<16x32xf32>
    %c0_91 = arith.constant 0 : index
    %c0_92 = arith.constant 0 : index
    %351 = vector.load %arg9[%c0_91, %c0_92] : memref<16x32xf32, #tpu.memory_space<vmem>>, vector<16x32xf32>
    tpu.vector_store %arg9[%c0_91, %c0_92], %350 {strides = array<i32>} : memref<16x32xf32, #tpu.memory_space<vmem>>, vector<16x32xf32>,
    %c0_93 = arith.constant 0 : index
    %c0_94 = arith.constant 0 : index
    %352 = tpu.strided_load %arg9[%c0_93, %c0_94] {strides = array<i32: 8, 1>} : memref<16x32xf32, #tpu.memory_space<vmem>>, vector<2x32xf32>
    %c0_95 = arith.constant 0 : index
    %c0_96 = arith.constant 0 : index
    %353 = vector.load %arg6[%c0_95, %c0_96] : memref<64x128xbf16, #tpu.memory_space<vmem>>, vector<32x32xbf16>
    %c32_97 = arith.constant 32 : index
    %c0_98 = arith.constant 0 : index
    %354 = vector.load %arg6[%c32_97, %c0_98] : memref<64x128xbf16, #tpu.memory_space<vmem>>, vector<32x128xbf16>
    %355 = arith.truncf %352 : vector<2x32xf32> to vector<2x32xbf16>
    %cst_99 = arith.constant dense<0.000000e+00> : vector<2x32xf32>
    %356 = tpu.matmul %355, %353, %cst_99 {dimension_numbers = #tpu.dot_dimension_numbers<[1], [0], [0], [1], [0, 0, 1, 1], [], []>} : vector<2x32xbf16>, vector<32x32xbf16>, vector<2x32xf32> -> vector<2x32xf32>
    %357 = vector.extract_strided_slice %0 {offsets = [18, 0], sizes = [1, 32], strides = [1, 1]} : vector<20x128xf32> to vector<1x32xf32>
    %358 = vector.broadcast %357 : vector<1x32xf32> to vector<2x32xf32>
    %359 = arith.addf %356, %358 : vector<2x32xf32>
    %360 = math.tanh %359 : vector<2x32xf32>
    %361 = arith.truncf %360 : vector<2x32xf32> to vector<2x32xbf16>
    %cst_100 = arith.constant dense<0.000000e+00> : vector<2x128xf32>
    %362 = tpu.matmul %361, %354, %cst_100 {dimension_numbers = #tpu.dot_dimension_numbers<[1], [0], [0], [1], [0, 0, 1, 1], [], []>} : vector<2x32xbf16>, vector<32x128xbf16>, vector<2x128xf32> -> vector<2x128xf32>
    %363 = vector.extract_strided_slice %0 {offsets = [19, 0], sizes = [1, 128], strides = [1, 1]} : vector<20x128xf32> to vector<1x128xf32>
    %364 = vector.broadcast %363 : vector<1x128xf32> to vector<2x128xf32>
    %365 = arith.addf %362, %364 : vector<2x128xf32>
    %cst_101 = arith.constant 0.000000e+00 : f32
    %366 = vector.broadcast %cst_101 : f32 to vector<2x128xf32>
    %367 = arith.maximumf %365, %366 : vector<2x128xf32>
    %c0_102 = arith.constant 0 : index
    %c0_103 = arith.constant 0 : index
    %368 = vector.load %arg8[%c0_102, %c0_103] : memref<2x128xf32, #tpu.memory_space<vmem>>, vector<2x128xf32>
    tpu.vector_store %arg8[%c0_102, %c0_103], %367 {strides = array<i32>} : memref<2x128xf32, #tpu.memory_space<vmem>>, vector<2x128xf32>,
    return
  }
}

</mosaic_0001>

<bundles_post_ra>
// kernel: bert_classifier_forward.1
= control target key start
LH: loop header
LB: loop body
LE: loop exit
PB: predicated region body
PF: predicated region fallthrough
CT: control target
= control target key end

     0   :  { %vm37_vm0 = vcmask 261120   ;;  %s3207_s0 = inlined_call_operand.vmem [shape: f32[16,32], index: 0, kind: input, shape index: {}]   ;;  %s3208_s1 = inlined_call_operand.vmem [shape: f32[2,8], index: 1, kind: input, shape index: {}]   ;;  %s3209_s2 = inlined_call_operand.vmem [shape: bf16[64,96], index: 2, kind: input, shape index: {}]   ;;  %s3210_s3 = inlined_call_operand.vmem [shape: bf16[64,32], index: 3, kind: input, shape index: {}]   ;;  %s3211_s4 = inlined_call_operand.vmem [shape: bf16[64,64], index: 4, kind: input, shape index: {}]   ;;  %s3212_s5 = inlined_call_operand.vmem [shape: bf16[128,32], index: 5, kind: input, shape index: {}]   ;;  %s3213_s6 = inlined_call_operand.vmem [shape: bf16[64,128], index: 6, kind: input, shape index: {}]   ;;  %s3214_s7 = inlined_call_operand.vmem [shape: f32[20,128], index: 7, kind: input, shape index: {}]   ;;  %s3215_s8 = inlined_call_operand.hbm [shape: f32[2,128], index: 8, kind: output, shape index: {}]  }
   0x1   :  { %v35_v0 = vld [vmem:[%s3207_s0] sm:$0xff]  ;;  %v36_v1 = vld [vmem:[%s3207_s0 + $0x8] sm:$0xff] }
   0x2   :  { %v38_v2 = vsel %vm37_vm0, %v35_v0, 0.0  ;;  %v41_v3 = vsel %vm37_vm0, %v36_v1, 0.0 }
   0x3   :  { %39 = vadd.xlane.f32.xlu0 %v38_v2 }
   0x7   :  { %42 = vadd.xlane.f32.xlu0 %v41_v3 }
   0x8   :  { %13 = vsyncpa [#allocation4], 0  ;;  %v2631_v14 = vld [vmem:[%s3209_s2 + $0x8] sm:$0xff]   ;;  %v2739_v15 = vmov 0.0   ;;  %vm2740_vm1 = vmmov 0   ;;  %v2632_v16 = vld [vmem:[%s3209_s2] sm:$0xff]   ;;  %v65_v23 = vlaneseq }
   0x9   :  { %2444 = vmatprep.subr.bf16.mxu0 %v2739_v15  ;;  %2448 = vmatprep.mubr.msk.bf16.mxu0 %vm2740_vm1, %v2739_v15  ;;  %v2825_v26 = vld [vmem:[%s3214_s7] sm:$0xff]  ;;  %s2741_s14 = smov 112   ;;  %s2742_s15 = smov 64   ;;  %vm165_vm2 = vcmask 130048   ;;  %vm240_vm3 = vcmask 64512   ;;  %vm1045_vm4 = vcmask 523264  }
   0xa   :  { %2445 = vmatpush3.bf16.msra.mxu0 %v2631_v14  ;;  %2452 = vmatprep.subr.mxu1 %v2739_v15  ;;  %v2817_v24 = vshrl.u32 %v65_v23, 7  ;;  %s2743_s16 = smov 80   ;;  %v34_v48 = vld [vmem:[%s3208_s1] sm:$0x3]  ;;  %s2744_s19 = smov 96  }
   0xb   :  { %2446 = vmatprep.subr.bf16.mxu0 %v2739_v15  ;;  %2454 = vmatprep.mubr.msk.f32.mxu1 %vm2740_vm1, %v2739_v15  ;;  %s2745_s1 = smov 48   ;;  %s2746_s24 = smov 16  }
   0xc   :  { %v2820_v25 = vsub.s32 0, %v2817_v24  ;;  %v2830_v30 = vsub.s32 1, %v2817_v24  ;;  %v2844_v39 = vsub.s32 2, %v2817_v24  ;;  %s2747_s21 = smov [#allocation3]  }
   0xd   :  { %s2312_s22 = sshll.u32 %s2747_s21, 4  ;;  %s2313_s22 = int_to_ptr.vmem [resolvable:$true] %s2312_s22 }
   0xe   :  { %2447 = vmatpush3.bf16.msra.mxu0 %v2632_v16  ;;  %v68_v29 = vrot.slane %v2825_v26, %v2820_v25  ;;  %v74_v34 = vrot.slane %v2825_v26, %v2830_v30  ;;  %v101_v40 = vrot.slane %v2825_v26, %v2844_v39  ;;  %v2870_v49 = vrot.slane %v34_v48, %v2820_v25  ;;  %p2722_p1 = scmp.lt.s32.totalorder %s2313_s22, %s2313_s22 }
   0xf   :  { %2467 = vmatprep.subr.mxu0 %v2739_v15 }
  0x8c   :  { %v40_v4 = vpop.xlane.xlu0 %39 }
  0x8d   :  { %v45_v5 = vmul.f32 0.03125, %v40_v4 }
  0x8f   :  { %v47_v6 = vsub.f32 %v35_v0, %v45_v5 }
  0x90   :  { %v43_v7 = vpop.xlane.xlu0 %42 }
  0x91   :  { %v46_v8 = vmul.f32 0.03125, %v43_v7  ;;  %v49_v9 = vmul.f32 %v47_v6, %v47_v6 }
  0x93   :  { %v48_v10 = vsub.f32 %v36_v1, %v46_v8  ;;  %v51_v11 = vsel %vm37_vm0, %v49_v9, 0.0  ;;  %v2905_v8 = vrot.slane %v34_v48, %v2830_v30 }
  0x94   :  { %52 = vadd.xlane.f32.xlu1 %v51_v11 }
  0x95   :  { %v50_v12 = vmul.f32 %v48_v10, %v48_v10 }
  0x97   :  { %v54_v13 = vsel %vm37_vm0, %v50_v12, 0.0 }
  0x98   :  { %55 = vadd.xlane.f32.xlu1 %v54_v13 }
 0x11d   :  { %v53_v17 = vpop.xlane.xlu1 %52 }
 0x11e   :  { %v57_v18 = vmul.f32 0.03125, %v53_v17 }
 0x120   :  { %v59_v19 = vadd.f32 1e-12, %v57_v18 }
 0x121   :  { %v56_v20 = vpop.xlane.xlu1 %55 }
 0x122   :  { %2655 = vrsqrt.f32 %v59_v19  ;;  %v58_v21 = vmul.f32 0.03125, %v56_v20 }
 0x124   :  { %v60_v22 = vadd.f32 1e-12, %v58_v21 }
 0x126   :  { %2657 = vrsqrt.f32 %v60_v22 }
 0x12f   :  { %v2656_v27 = vpop.eup %2655 }
 0x130   :  { %v63_v28 = vmul.f32 %v2656_v27, %v47_v6 }
 0x132   :  { %v69_v33 = vmul.f32 %v68_v29, %v63_v28 }
 0x133   :  { %v2658_v31 = vpop.eup %2657 }
 0x134   :  { %v64_v32 = vmul.f32 %v2658_v31, %v48_v10  ;;  %v2834_v36 = vadd.f32 %v74_v34, %v69_v33 }
 0x136   :  { %v70_v35 = vmul.f32 %v68_v29, %v64_v32 }
 0x138   :  { %v2836_v37 = vadd.f32 %v74_v34, %v70_v35 }
 0x13a   :  { %v97_v38 = vpack.c.bf16 %v2836_v37, %v2834_v36 }
 0x13c   :  { %2449 = vmatmul.mubr.msk.bf16.vlgmr.msra.gmra.mxu0 %vm37_vm0, %v97_v38 }
 0x13d   :  { %2469 = vmatprep.mubr.msk.f32.mxu0 %vm2740_vm1, %v2739_v15 }
 0x1fc   :  { %v151_v41 = vpop.f32.mrf.mxu0 }
 0x1fd   :  { %v2848_v42 = vadd.f32 %v151_v41, %v101_v40 }
 0x1fe   :  { %v2450_v43 = vpop.f32.mrf.mxu0 }
 0x1ff   :  { %163 = vrot.lane.b32.xlu0 %v2848_v42, %s2741_s14 }
 0x200   :  { %v154_v44 = vpop.f32.mrf.mxu0 }
 0x201   :  { %v2854_v46 = vadd.f32 %v154_v44, %v101_v40 }
 0x202   :  { %v2451_v45 = vpop.f32.mrf.mxu0 }
 0x203   :  { %330 = vrot.lane.b32.xlu0 %v2848_v42, %s2742_s15 }
 0x207   :  { %503 = vrot.lane.b32.xlu0 %v2854_v46, %s2741_s14 }
 0x20b   :  { %666 = vrot.lane.b32.xlu0 %v2854_v46, %s2743_s16 }
 0x271   :  { %v164_v47 = vpop.permute.xlu0 %163 }
 0x272   :  { %2453 = vmatpush3.xpose.msk.msra.mxu1 %vm165_vm2, %v164_v47 }
 0x273   :  { %2457 = vmatprep.subr.mxu1 %v2739_v15 }
 0x275   :  { %2455 = vmatmul.mubr.msk.f32.vlgmr.msra.gmra.mxu1 %vm165_vm2, %v2848_v42  ;;  %v331_v62 = vpop.permute.xlu0 %330 }
 0x276   :  { %2459 = vmatprep.mubr.msk.f32.mxu1 %vm2740_vm1, %v2739_v15 }
 0x279   :  { %v504_v1 = vpop.permute.xlu0 %503 }
 0x27d   :  { %v667_v3 = vpop.permute.xlu0 %666 }
 0x335   :  { %v236_v50 = vpop.f32.mrf.mxu1 }
 0x336   :  { %v237_v51 = vadd.f32 %v236_v50, %v2870_v49 }
 0x337   :  { %v2456_v52 = vpop.f32.mrf.mxu1 }
 0x338   :  { %v241_v53 = vsel %vm240_vm3, %v237_v51, -inf }
 0x339   :  { %242 = vmax.xlane.f32.xlu1 %v241_v53 }
 0x34a   :  { %252 = vrot.lane.b32.xlu1 %v2848_v42, %s2744_s19 }
 0x3c2   :  { %v243_v54 = vpop.xlane.xlu1 %242 }
 0x3c3   :  { %v244_v55 = vsub.f32 %v237_v51, %v243_v54 }
 0x3c5   :  { %v245_v56 = vmul.f32 1.442695, %v244_v55  ;;  %v2633_v55 = vld [vmem:[%s3210_s3 + $0x8] sm:$0xff]  }
 0x3c6   :  { %v253_v57 = vpop.permute.xlu1 %252 }
 0x3c7   :  { %2659 = vpow2.f32 %v245_v56  ;;  %2458 = vmatpush3.msra.mxu1 %v253_v57  ;;  %v2634_v56 = vld [vmem:[%s3210_s3] sm:$0xff]  }
 0x3c8   :  { %2462 = vmatprep.subr.mxu1 %v2739_v15 }
 0x3d4   :  { %v2660_v58 = vpop.eup %2659 }
 0x3d5   :  { %v247_v59 = vsel %vm240_vm3, %v2660_v58, 0.0 }
 0x3d6   :  { %248 = vadd.xlane.f32.xlu1 %v247_v59 }
 0x3e7   :  { %328 = vrot.lane.b32.xlu1 %v2848_v42, %s2743_s16 }
 0x3eb   :  { %668 = vrot.lane.b32.xlu1 %v2854_v46, %s2742_s15 }
 0x45f   :  { %v249_v60 = vpop.xlane.xlu1 %248 }
 0x460   :  { %2661 = vrcp.f32 %v249_v60 }
 0x463   :  { %v329_v0 = vpop.permute.xlu1 %328 }
 0x467   :  { %v669_v2 = vpop.permute.xlu1 %668 }
 0x46d   :  { %v2662_v61 = vpop.eup %2661 }
 0x46e   :  { %v251_v63 = vmul.f32 %v2662_v61, %v2660_v58 }
 0x470   :  { %2460 = vmatmul.mubr.msk.f32.vlgmr.msra.gmra.mxu1 %vm240_vm3, %v251_v63 }
 0x471   :  { %2463 = vmatpush3.xpose.msk.msra.mxu1 %vm165_vm2, %v331_v62  ;;  %2464 = vmatprep.mubr.msk.f32.mxu1 %vm2740_vm1, %v2739_v15 }
 0x472   :  { %2472 = vmatprep.subr.mxu1 %v2739_v15 }
 0x474   :  { %2465 = vmatmul.mubr.msk.f32.vlgmr.msra.gmra.mxu1 %vm165_vm2, %v329_v0 }
 0x475   :  { %2473 = vmatpush3.xpose.msk.msra.mxu1 %vm165_vm2, %v504_v1  ;;  %2474 = vmatprep.mubr.msk.f32.mxu1 %vm2740_vm1, %v2739_v15 }
 0x476   :  { %2482 = vmatprep.subr.mxu1 %v2739_v15 }
 0x478   :  { %2475 = vmatmul.mubr.msk.f32.vlgmr.msra.gmra.mxu1 %vm165_vm2, %v2854_v46 }
 0x479   :  { %2483 = vmatpush3.xpose.msk.msra.mxu1 %vm165_vm2, %v669_v2  ;;  %2484 = vmatprep.mubr.msk.f32.mxu1 %vm2740_vm1, %v2739_v15 }
 0x47a   :  { %2492 = vmatprep.subr.bf16.mxu1 %v2739_v15 }
 0x47c   :  { %2485 = vmatmul.mubr.msk.f32.vlgmr.msra.gmra.mxu1 %vm165_vm2, %v667_v3 }
 0x47d   :  { %2496 = vmatprep.mubr.msk.bf16.mxu1 %vm2740_vm1, %v2739_v15  ;;  %2493 = vmatpush3.bf16.msra.mxu1 %v2633_v55 }
 0x47e   :  { %2494 = vmatprep.subr.bf16.mxu1 %v2739_v15 }
 0x481   :  { %2495 = vmatpush3.bf16.msra.mxu1 %v2634_v56 }
 0x482   :  { %2508 = vmatprep.subr.bf16.mxu1 %v2739_v15 }
 0x530   :  { %v2901_v4 = vpop.f32.mrf.mxu1 }
 0x532   :  { %v2461_v5 = vpop.f32.mrf.mxu1 }
 0x534   :  { %v402_v6 = vpop.f32.mrf.mxu1 }
 0x535   :  { %v403_v7 = vadd.f32 %v402_v6, %v2870_v49 }
 0x536   :  { %v2466_v9 = vpop.f32.mrf.mxu1 }
 0x537   :  { %v406_v10 = vsel %vm240_vm3, %v403_v7, -inf }
 0x538   :  { %407 = vmax.xlane.f32.xlu1 %v406_v10  ;;  %v575_v11 = vpop.f32.mrf.mxu1 }
 0x539   :  { %v576_v12 = vadd.f32 %v575_v11, %v2905_v8 }
 0x53a   :  { %v2476_v13 = vpop.f32.mrf.mxu1 }
 0x53b   :  { %v579_v14 = vsel %vm240_vm3, %v576_v12, -inf }
 0x53c   :  { %580 = vmax.xlane.f32.xlu0 %v579_v14  ;;  %v740_v16 = vpop.f32.mrf.mxu1 }
 0x53d   :  { %v741_v17 = vadd.f32 %v740_v16, %v2905_v8 }
 0x53e   :  { %v2486_v18 = vpop.f32.mrf.mxu1 }
 0x53f   :  { %v744_v19 = vsel %vm240_vm3, %v741_v17, -inf }
 0x540   :  { %745 = vmax.xlane.f32.xlu0 %v744_v19 }
 0x549   :  { %417 = vrot.lane.b32.xlu1 %v2848_v42, %s2745_s1 }
 0x5c1   :  { %v408_v20 = vpop.xlane.xlu1 %407 }
 0x5c2   :  { %v409_v21 = vsub.f32 %v403_v7, %v408_v20  ;;  %v2949_v7 = vsub.s32 3, %v2817_v24 }
 0x5c4   :  { %v410_v22 = vmul.f32 1.442695, %v409_v21  ;;  %v840_v9 = vrot.slane %v2825_v26, %v2949_v7 }
 0x5c5   :  { %v418_v23 = vpop.permute.xlu1 %417  ;;  %v581_v27 = vpop.xlane.xlu0 %580 }
 0x5c6   :  { %2663 = vpow2.f32 %v410_v22  ;;  %v582_v28 = vsub.f32 %v576_v12, %v581_v27  ;;  %2468 = vmatpush3.msra.mxu0 %v418_v23 }
 0x5c7   :  { %2477 = vmatprep.subr.mxu0 %v2739_v15 }
 0x5c8   :  { %v583_v29 = vmul.f32 1.442695, %v582_v28 }
 0x5c9   :  { %v746_v31 = vpop.xlane.xlu0 %745 }
 0x5ca   :  { %2665 = vpow2.f32 %v583_v29  ;;  %v747_v32 = vsub.f32 %v741_v17, %v746_v31 }
 0x5cc   :  { %v748_v33 = vmul.f32 1.442695, %v747_v32 }
 0x5ce   :  { %2667 = vpow2.f32 %v748_v33  ;;  %v2636_v33 = vld [vmem:[%s3211_s4] sm:$0xff]  }
 0x5d3   :  { %v2664_v34 = vpop.eup %2663 }
 0x5d4   :  { %v412_v35 = vsel %vm240_vm3, %v2664_v34, 0.0 }
 0x5d5   :  { %413 = vadd.xlane.f32.xlu0 %v412_v35 }
 0x5d7   :  { %v2666_v38 = vpop.eup %2665 }
 0x5d8   :  { %v585_v40 = vsel %vm240_vm3, %v2666_v38, 0.0 }
 0x5d9   :  { %586 = vadd.xlane.f32.xlu1 %v585_v40 }
 0x5db   :  { %v2668_v41 = vpop.eup %2667 }
 0x5dc   :  { %v750_v42 = vsel %vm240_vm3, %v2668_v41, 0.0 }
 0x5dd   :  { %751 = vadd.xlane.f32.xlu0 %v750_v42 }
 0x5ea   :  { %755 = vrot.lane.b32.xlu1 %v2854_v46, %s2745_s1 }
 0x5f3   :  { %590 = vrot.lane.b32.xlu0 %v2854_v46, %s2744_s19 }
 0x65e   :  { %v414_v43 = vpop.xlane.xlu0 %413 }
 0x65f   :  { %2669 = vrcp.f32 %v414_v43  ;;  %v927_v43 = vsub.s32 4, %v2817_v24 }
 0x662   :  { %v587_v44 = vpop.xlane.xlu1 %586 }
 0x663   :  { %2671 = vrcp.f32 %v587_v44 }
 0x666   :  { %v752_v45 = vpop.xlane.xlu0 %751  ;;  %v756_v46 = vpop.permute.xlu1 %755 }
 0x667   :  { %2673 = vrcp.f32 %v752_v45 }
 0x66a   :  { %v591_v50 = vpop.permute.xlu0 %590 }
 0x66c   :  { %v2670_v47 = vpop.eup %2669 }
 0x66d   :  { %v416_v48 = vmul.f32 %v2670_v47, %v2664_v34  ;;  %v928_v47 = vrot.slane %v2825_v26, %v927_v43 }
 0x66f   :  { %2470 = vmatmul.mubr.msk.f32.vlgmr.msra.gmra.mxu0 %vm240_vm3, %v416_v48  ;;  %v933_v48 = vsub.s32 5, %v2817_v24 }
 0x670   :  { %v2672_v51 = vpop.eup %2671  ;;  %2478 = vmatpush3.msra.mxu0 %v591_v50  ;;  %2479 = vmatprep.mubr.msk.f32.mxu0 %vm2740_vm1, %v2739_v15 }
 0x671   :  { %2487 = vmatprep.subr.mxu0 %v2739_v15  ;;  %v589_v52 = vmul.f32 %v2672_v51, %v2666_v38 }
 0x673   :  { %2480 = vmatmul.mubr.msk.f32.vlgmr.msra.gmra.mxu0 %vm240_vm3, %v589_v52 }
 0x674   :  { %v2674_v53 = vpop.eup %2673  ;;  %2488 = vmatpush3.msra.mxu0 %v756_v46  ;;  %2489 = vmatprep.mubr.msk.f32.mxu0 %vm2740_vm1, %v2739_v15  ;;  %v934_v46 = vrot.slane %v2825_v26, %v933_v48 }
 0x675   :  { %v754_v54 = vmul.f32 %v2674_v53, %v2668_v41  ;;  %2500 = vmatprep.subr.bf16.mxu0 %v2739_v15 }
 0x677   :  { %2490 = vmatmul.mubr.msk.f32.vlgmr.msra.gmra.mxu0 %vm240_vm3, %v754_v54 }
 0x678   :  { %2504 = vmatprep.mubr.msk.bf16.mxu0 %vm2740_vm1, %v2739_v15 }
 0x72f   :  { %v489_v57 = vpop.f32.mrf.mxu0 }
 0x731   :  { %v2471_v58 = vpop.f32.mrf.mxu0 }
 0x732   :  { %v2638_v58 = vld [vmem:[%s3212_s5 + $0x10] sm:$0xff]  }
 0x733   :  { %v662_v59 = vpop.f32.mrf.mxu0 }
 0x735   :  { %v2481_v60 = vpop.f32.mrf.mxu0 }
 0x736   :  { %v2640_v60 = vld [vmem:[%s3212_s5] sm:$0xff]  }
 0x737   :  { %v827_v61 = vpop.f32.mrf.mxu0 }
 0x738   :  { %v2621_v62 = vpack.i.bf16 %v827_v61, %v489_v57  ;;  %v2637_v57 = vld [vmem:[%s3212_s5 + $0x18] sm:$0xff]   ;;  %v940_v61 = vsub.s32 6, %v2817_v24 }
 0x739   :  { %v2491_v63 = vpop.f32.mrf.mxu0 }
 0x73a   :  { %2622 = vrot.lane.b32.xlu1 %v2621_v62, %s2746_s24  ;;  %v941_v62 = vrot.slane %v2825_v26, %v940_v61 }
 0x7ac   :  { %v2623_v0 = vpop.permute.xlu1 %2622 }
 0x7ad   :  { %v2625_v1 = vunpack.i.h.bf16 %v2623_v0  ;;  %v2624_v2 = vunpack.i.l.bf16 %v2623_v0 }
 0x7af   :  { %v835_v3 = vsel %vm165_vm2, %v662_v59, %v2625_v1  ;;  %v497_v5 = vsel %vm165_vm2, %v2901_v4, %v2624_v2  ;;  %v2639_v59 = vld [vmem:[%s3212_s5 + $0x8] sm:$0xff]  }
 0x7b0   :  { %v836_v6 = vpack.c.bf16 %v835_v3, %v497_v5 }
 0x7b2   :  { %2497 = vmatmul.mubr.msk.bf16.vlgmr.msra.gmra.mxu1 %vm37_vm0, %v836_v6 }
 0x7b3   :  { %2516 = vmatprep.mubr.msk.bf16.mxu1 %vm2740_vm1, %v2739_v15  ;;  %2509 = vmatpush3.bf16.msra.mxu1 %v2637_v57  ;;  %v2642_v57 = vld [vmem:[%s3209_s2 + $0x10] sm:$0xff]  }
 0x7b4   :  { %2510 = vmatprep.subr.bf16.mxu1 %v2739_v15 }
 0x7b7   :  { %2511 = vmatpush3.bf16.msra.mxu1 %v2638_v58 }
 0x7b8   :  { %2512 = vmatprep.subr.bf16.mxu1 %v2739_v15 }
 0x7bb   :  { %2513 = vmatpush3.bf16.msra.mxu1 %v2639_v59 }
 0x7bc   :  { %2514 = vmatprep.subr.bf16.mxu1 %v2739_v15 }
 0x7bf   :  { %2515 = vmatpush3.bf16.msra.mxu1 %v2640_v60 }
 0x7c0   :  { %2538 = vmatprep.subr.mxu1 %v2739_v15 }
 0x872   :  { %v890_v10 = vpop.f32.mrf.mxu1 }
 0x873   :  { %v891_v11 = vadd.f32 %v890_v10, %v840_v9 }
 0x874   :  { %v2498_v12 = vpop.f32.mrf.mxu1 }
 0x875   :  { %v897_v13 = vadd.f32 %v891_v11, %v2834_v36 }
 0x876   :  { %v893_v14 = vpop.f32.mrf.mxu1 }
 0x877   :  { %v894_v16 = vadd.f32 %v893_v14, %v840_v9  ;;  %v899_v4 = vsel %vm37_vm0, %v897_v13, 0.0 }
 0x878   :  { %900 = vadd.xlane.f32.xlu1 %v899_v4  ;;  %v2499_v17 = vpop.f32.mrf.mxu1 }
 0x879   :  { %v898_v18 = vadd.f32 %v894_v16, %v2836_v37  ;;  %v2635_v37 = vld [vmem:[%s3211_s4 + $0x8] sm:$0xff]  }
 0x87a   :  { %2501 = vmatpush3.bf16.msra.mxu0 %v2635_v37 }
 0x87b   :  { %v902_v19 = vsel %vm37_vm0, %v898_v18, 0.0  ;;  %2502 = vmatprep.subr.bf16.mxu0 %v2739_v15 }
 0x87c   :  { %903 = vadd.xlane.f32.xlu0 %v902_v19 }
 0x87e   :  { %2503 = vmatpush3.bf16.msra.mxu0 %v2636_v33 }
 0x87f   :  { %2520 = vmatprep.subr.bf16.mxu0 %v2739_v15 }
 0x901   :  { %v901_v20 = vpop.xlane.xlu1 %900 }
 0x902   :  { %v905_v21 = vmul.f32 0.03125, %v901_v20 }
 0x904   :  { %v907_v22 = vsub.f32 %v897_v13, %v905_v21 }
 0x905   :  { %v904_v23 = vpop.xlane.xlu0 %903 }
 0x906   :  { %v906_v27 = vmul.f32 0.03125, %v904_v23  ;;  %v909_v28 = vmul.f32 %v907_v22, %v907_v22 }
 0x908   :  { %v908_v29 = vsub.f32 %v898_v18, %v906_v27  ;;  %v911_v36 = vsel %vm37_vm0, %v909_v28, 0.0 }
 0x909   :  { %912 = vadd.xlane.f32.xlu0 %v911_v36  ;;  %v1019_v36 = vsub.s32 7, %v2817_v24 }
 0x90a   :  { %v910_v31 = vmul.f32 %v908_v29, %v908_v29 }
 0x90c   :  { %v914_v32 = vsel %vm37_vm0, %v910_v31, 0.0  ;;  %v1020_v31 = vrot.slane %v2825_v26, %v1019_v36 }
 0x90d   :  { %915 = vadd.xlane.f32.xlu0 %v914_v32 }
 0x992   :  { %v913_v34 = vpop.xlane.xlu0 %912 }
 0x993   :  { %v917_v35 = vmul.f32 0.03125, %v913_v34 }
 0x995   :  { %v919_v38 = vadd.f32 1e-12, %v917_v35 }
 0x996   :  { %v916_v40 = vpop.xlane.xlu0 %915 }
 0x997   :  { %2675 = vrsqrt.f32 %v919_v38  ;;  %v918_v41 = vmul.f32 0.03125, %v916_v40 }
 0x999   :  { %v920_v42 = vadd.f32 1e-12, %v918_v41 }
 0x99b   :  { %2677 = vrsqrt.f32 %v920_v42 }
 0x9a4   :  { %v2676_v44 = vpop.eup %2675 }
 0x9a5   :  { %v923_v45 = vmul.f32 %v2676_v44, %v907_v22 }
 0x9a7   :  { %v929_v52 = vmul.f32 %v928_v47, %v923_v45 }
 0x9a8   :  { %v2678_v50 = vpop.eup %2677 }
 0x9a9   :  { %v924_v51 = vmul.f32 %v2678_v50, %v908_v29  ;;  %v935_v54 = vadd.f32 %v934_v46, %v929_v52 }
 0x9ab   :  { %v930_v53 = vmul.f32 %v928_v47, %v924_v51 }
 0x9ad   :  { %v936_v55 = vadd.f32 %v934_v46, %v930_v53 }
 0x9af   :  { %v937_v56 = vpack.c.bf16 %v936_v55, %v935_v54 }
 0x9b1   :  { %2505 = vmatmul.mubr.msk.bf16.vlgmr.msra.gmra.mxu0 %vm37_vm0, %v937_v56 }
 0x9b2   :  { %2524 = vmatprep.mubr.msk.bf16.mxu0 %vm2740_vm1, %v2739_v15 }
 0xa71   :  { %v991_v63 = vpop.f32.mrf.mxu0 }
 0xa72   :  { %v992_v0 = vadd.f32 %v991_v63, %v941_v62 }
 0xa73   :  { %v2506_v1 = vpop.f32.mrf.mxu0 }
 0xa74   :  { %v998_v2 = vmul.f32 %v992_v0, %v992_v0  ;;  %v3020_v1 = vld [vmem:[%s3214_s7 + $0x8] sm:$0xff] }
 0xa75   :  { %v994_v3 = vpop.f32.mrf.mxu0 }
 0xa76   :  { %v1000_v5 = vmul.f32 %v998_v2, %v992_v0  ;;  %v995_v6 = vadd.f32 %v994_v3, %v941_v62 }
 0xa77   :  { %v2507_v9 = vpop.f32.mrf.mxu0 }
 0xa78   :  { %v1002_v10 = vmul.f32 0.044715, %v1000_v5  ;;  %v999_v11 = vmul.f32 %v995_v6, %v995_v6  ;;  %v1121_v5 = vrot.slane %v3020_v1, %v2820_v25 }
 0xa7a   :  { %v1004_v12 = vadd.f32 %v1002_v10, %v992_v0  ;;  %v1001_v13 = vmul.f32 %v999_v11, %v995_v6  ;;  %v1127_v11 = vrot.slane %v3020_v1, %v2830_v30 }
 0xa7c   :  { %v1006_v14 = vmul.f32 0.7978846, %v1004_v12  ;;  %v1003_v16 = vmul.f32 0.044715, %v1001_v13 }
 0xa7e   :  { %2679 = vtanh.f32 %v1006_v14  ;;  %v1005_v4 = vadd.f32 %v1003_v16, %v995_v6 }
 0xa80   :  { %v1007_v17 = vmul.f32 0.7978846, %v1005_v4  ;;  %v1154_v4 = vrot.slane %v3020_v1, %v2844_v39 }
 0xa82   :  { %2681 = vtanh.f32 %v1007_v17 }
 0xa8b   :  { %v2680_v18 = vpop.eup %2679 }
 0xa8c   :  { %v1010_v19 = vadd.f32 1.0, %v2680_v18 }
 0xa8e   :  { %v1012_v21 = vmul.f32 0.5, %v1010_v19 }
 0xa8f   :  { %v2682_v20 = vpop.eup %2681 }
 0xa90   :  { %v1011_v22 = vadd.f32 1.0, %v2682_v20  ;;  %v1014_v27 = vmul.f32 %v1012_v21, %v992_v0 }
 0xa92   :  { %v1013_v23 = vmul.f32 0.5, %v1011_v22 }
 0xa94   :  { %v1015_v28 = vmul.f32 %v1013_v23, %v995_v6 }
 0xa96   :  { %v1016_v29 = vpack.c.bf16 %v1015_v28, %v1014_v27 }
 0xa98   :  { %2517 = vmatmul.mubr.msk.bf16.vlgmr.msra.gmra.mxu1 %vm1045_vm4, %v1016_v29 }
 0xa99   :  { %2540 = vmatprep.mubr.msk.f32.mxu1 %vm2740_vm1, %v2739_v15 }
 0xb58   :  { %v1083_v32 = vpop.f32.mrf.mxu1 }
 0xb59   :  { %v1084_v37 = vadd.f32 %v1083_v32, %v1020_v31 }
 0xb5a   :  { %v2518_v33 = vpop.f32.mrf.mxu1 }
 0xb5b   :  { %v1090_v34 = vadd.f32 %v1084_v37, %v935_v54 }
 0xb5c   :  { %v1086_v35 = vpop.f32.mrf.mxu1 }
 0xb5d   :  { %v1087_v38 = vadd.f32 %v1086_v35, %v1020_v31  ;;  %v1092_v40 = vsel %vm37_vm0, %v1090_v34, 0.0 }
 0xb5e   :  { %1093 = vadd.xlane.f32.xlu1 %v1092_v40  ;;  %v2519_v41 = vpop.f32.mrf.mxu1 }
 0xb5f   :  { %v1091_v42 = vadd.f32 %v1087_v38, %v936_v55  ;;  %v2641_v55 = vld [vmem:[%s3209_s2 + $0x18] sm:$0xff]  }
 0xb60   :  { %2521 = vmatpush3.bf16.msra.mxu0 %v2641_v55 }
 0xb61   :  { %v1095_v44 = vsel %vm37_vm0, %v1091_v42, 0.0  ;;  %2522 = vmatprep.subr.bf16.mxu0 %v2739_v15 }
 0xb62   :  { %1096 = vadd.xlane.f32.xlu0 %v1095_v44 }
 0xb64   :  { %2523 = vmatpush3.bf16.msra.mxu0 %v2642_v57 }
 0xb65   :  { %2528 = vmatprep.subr.mxu0 %v2739_v15 }
 0xbe7   :  { %v1094_v45 = vpop.xlane.xlu1 %1093 }
 0xbe8   :  { %v1098_v47 = vmul.f32 0.03125, %v1094_v45 }
 0xbea   :  { %v1100_v50 = vsub.f32 %v1090_v34, %v1098_v47 }
 0xbeb   :  { %v1097_v51 = vpop.xlane.xlu0 %1096 }
 0xbec   :  { %v1099_v52 = vmul.f32 0.03125, %v1097_v51  ;;  %v1102_v26 = vmul.f32 %v1100_v50, %v1100_v50 }
 0xbee   :  { %v1101_v46 = vsub.f32 %v1091_v42, %v1099_v52  ;;  %v1104_v53 = vsel %vm37_vm0, %v1102_v26, 0.0 }
 0xbef   :  { %1105 = vadd.xlane.f32.xlu1 %v1104_v53 }
 0xbf0   :  { %v1103_v54 = vmul.f32 %v1101_v46, %v1101_v46 }
 0xbf2   :  { %v1107_v56 = vsel %vm37_vm0, %v1103_v54, 0.0 }
 0xbf3   :  { %1108 = vadd.xlane.f32.xlu0 %v1107_v56 }
 0xc78   :  { %v1106_v58 = vpop.xlane.xlu1 %1105 }
 0xc79   :  { %v1110_v59 = vmul.f32 0.03125, %v1106_v58 }
 0xc7b   :  { %v1112_v60 = vadd.f32 1e-12, %v1110_v59 }
 0xc7c   :  { %v1109_v62 = vpop.xlane.xlu0 %1108 }
 0xc7d   :  { %2683 = vrsqrt.f32 %v1112_v60  ;;  %v1111_v63 = vmul.f32 0.03125, %v1109_v62 }
 0xc7f   :  { %v1113_v0 = vadd.f32 1e-12, %v1111_v63 }
 0xc81   :  { %2685 = vrsqrt.f32 %v1113_v0 }
 0xc8a   :  { %v2684_v2 = vpop.eup %2683 }
 0xc8b   :  { %v1116_v3 = vmul.f32 %v2684_v2, %v1100_v50 }
 0xc8d   :  { %v1122_v10 = vmul.f32 %v1121_v5, %v1116_v3 }
 0xc8e   :  { %v2686_v6 = vpop.eup %2685 }
 0xc8f   :  { %v1117_v9 = vmul.f32 %v2686_v6, %v1101_v46  ;;  %v3026_v13 = vadd.f32 %v1127_v11, %v1122_v10 }
 0xc91   :  { %v1123_v12 = vmul.f32 %v1121_v5, %v1117_v9 }
 0xc93   :  { %v3028_v14 = vadd.f32 %v1127_v11, %v1123_v12 }
 0xc95   :  { %v1150_v16 = vpack.c.bf16 %v3028_v14, %v3026_v13 }
 0xc97   :  { %2525 = vmatmul.mubr.msk.bf16.vlgmr.msra.gmra.mxu0 %vm37_vm0, %v1150_v16 }
 0xc98   :  { %2530 = vmatprep.mubr.msk.f32.mxu0 %vm2740_vm1, %v2739_v15 }
 0xd57   :  { %v1204_v17 = vpop.f32.mrf.mxu0 }
 0xd58   :  { %v3037_v18 = vadd.f32 %v1204_v17, %v1154_v4 }
 0xd59   :  { %v2526_v19 = vpop.f32.mrf.mxu0 }
 0xd5a   :  { %1377 = vrot.lane.b32.xlu0 %v3037_v18, %s2742_s15  ;;  %1212 = vrot.lane.b32.xlu1 %v3037_v18, %s2741_s14 }
 0xd5b   :  { %v1207_v20 = vpop.f32.mrf.mxu0 }
 0xd5c   :  { %v3043_v21 = vadd.f32 %v1207_v20, %v1154_v4 }
 0xd5d   :  { %v2527_v22 = vpop.f32.mrf.mxu0 }
 0xd5e   :  { %1375 = vrot.lane.b32.xlu1 %v3037_v18, %s2743_s16  ;;  %1709 = vrot.lane.b32.xlu0 %v3043_v21, %s2743_s16 }
 0xd62   :  { %1546 = vrot.lane.b32.xlu1 %v3043_v21, %s2741_s14 }
 0xd66   :  { %1711 = vrot.lane.b32.xlu1 %v3043_v21, %s2742_s15 }
 0xdcc   :  { %v1378_v23 = vpop.permute.xlu0 %1377  ;;  %v1213_v27 = vpop.permute.xlu1 %1212 }
 0xdcd   :  { %2529 = vmatpush3.xpose.msk.msra.mxu0 %vm165_vm2, %v1213_v27  ;;  %2539 = vmatpush3.xpose.msk.msra.mxu1 %vm165_vm2, %v1378_v23 }
 0xdce   :  { %2548 = vmatprep.subr.mxu1 %v2739_v15  ;;  %2533 = vmatprep.subr.mxu0 %v2739_v15 }
 0xdd0   :  { %2531 = vmatmul.mubr.msk.f32.vlgmr.msra.gmra.mxu0 %vm165_vm2, %v3037_v18  ;;  %v1376_v28 = vpop.permute.xlu1 %1375  ;;  %v1710_v32 = vpop.permute.xlu0 %1709 }
 0xdd1   :  { %2541 = vmatmul.mubr.msk.f32.vlgmr.msra.gmra.mxu1 %vm165_vm2, %v1376_v28  ;;  %2535 = vmatprep.mubr.msk.f32.mxu0 %vm2740_vm1, %v2739_v15 }
 0xdd2   :  { %2550 = vmatprep.mubr.msk.f32.mxu1 %vm2740_vm1, %v2739_v15 }
 0xdd4   :  { %v1547_v29 = vpop.permute.xlu1 %1546 }
 0xdd5   :  { %2549 = vmatpush3.xpose.msk.msra.mxu1 %vm165_vm2, %v1547_v29 }
 0xdd6   :  { %2558 = vmatprep.subr.mxu1 %v2739_v15 }
 0xdd8   :  { %2551 = vmatmul.mubr.msk.f32.vlgmr.msra.gmra.mxu1 %vm165_vm2, %v3043_v21  ;;  %v1712_v31 = vpop.permute.xlu1 %1711 }
 0xdd9   :  { %2559 = vmatpush3.xpose.msk.msra.mxu1 %vm165_vm2, %v1712_v31  ;;  %2560 = vmatprep.mubr.msk.f32.mxu1 %vm2740_vm1, %v2739_v15 }
 0xdda   :  { %2568 = vmatprep.subr.bf16.mxu1 %v2739_v15 }
 0xddc   :  { %2561 = vmatmul.mubr.msk.f32.vlgmr.msra.gmra.mxu1 %vm165_vm2, %v1710_v32 }
 0xddd   :  { %2572 = vmatprep.mubr.msk.bf16.mxu1 %vm2740_vm1, %v2739_v15 }
 0xe90   :  { %v1284_v37 = vpop.f32.mrf.mxu0 }
 0xe91   :  { %v1285_v33 = vadd.f32 %v1284_v37, %v2870_v49  ;;  %v1449_v34 = vpop.f32.mrf.mxu1 }
 0xe92   :  { %v1450_v35 = vadd.f32 %v1449_v34, %v2870_v49  ;;  %v2532_v38 = vpop.f32.mrf.mxu0 }
 0xe93   :  { %v2542_v40 = vpop.f32.mrf.mxu1  ;;  %v1288_v41 = vsel %vm240_vm3, %v1285_v33, -inf  ;;  %v2644_v38 = vld [vmem:[%s3210_s3 + $0x10] sm:$0xff]  }
 0xe94   :  { %1289 = vmax.xlane.f32.xlu1 %v1288_v41  ;;  %v1453_v42 = vsel %vm240_vm3, %v1450_v35, -inf }
 0xe95   :  { %1454 = vmax.xlane.f32.xlu0 %v1453_v42 }
 0xe98   :  { %v1618_v44 = vpop.f32.mrf.mxu1 }
 0xe99   :  { %v1619_v45 = vadd.f32 %v1618_v44, %v2905_v8 }
 0xe9a   :  { %v2552_v47 = vpop.f32.mrf.mxu1 }
 0xe9b   :  { %v1622_v50 = vsel %vm240_vm3, %v1619_v45, -inf }
 0xe9c   :  { %1623 = vmax.xlane.f32.xlu0 %v1622_v50  ;;  %v1783_v51 = vpop.f32.mrf.mxu1 }
 0xe9d   :  { %v1784_v52 = vadd.f32 %v1783_v51, %v2905_v8 }
 0xe9e   :  { %v2562_v26 = vpop.f32.mrf.mxu1 }
 0xe9f   :  { %v1787_v49 = vsel %vm240_vm3, %v1784_v52, -inf }
 0xea0   :  { %1788 = vmax.xlane.f32.xlu0 %v1787_v49 }
 0xea5   :  { %1299 = vrot.lane.b32.xlu1 %v3037_v18, %s2744_s19 }
 0xf1d   :  { %v1290_v46 = vpop.xlane.xlu1 %1289 }
 0xf1e   :  { %v1291_v53 = vsub.f32 %v1285_v33, %v1290_v46  ;;  %v1455_v54 = vpop.xlane.xlu0 %1454  ;;  %v2643_v33 = vld [vmem:[%s3210_s3 + $0x18] sm:$0xff]  }
 0xf1f   :  { %v1456_v56 = vsub.f32 %v1450_v35, %v1455_v54  ;;  %2569 = vmatpush3.bf16.msra.mxu1 %v2643_v33  ;;  %v1883_v54 = vrot.slane %v3020_v1, %v2949_v7 }
 0xf20   :  { %v1292_v55 = vmul.f32 1.442695, %v1291_v53  ;;  %2570 = vmatprep.subr.bf16.mxu1 %v2739_v15 }
 0xf21   :  { %v1457_v57 = vmul.f32 1.442695, %v1456_v56  ;;  %v1300_v58 = vpop.permute.xlu1 %1299 }
 0xf22   :  { %2687 = vpow2.f32 %v1292_v55  ;;  %2534 = vmatpush3.msra.mxu0 %v1300_v58 }
 0xf23   :  { %2689 = vpow2.f32 %v1457_v57  ;;  %2543 = vmatprep.subr.mxu0 %v2739_v15  ;;  %2571 = vmatpush3.bf16.msra.mxu1 %v2644_v38 }
 0xf24   :  { %2584 = vmatprep.subr.bf16.mxu1 %v2739_v15 }
 0xf25   :  { %v1624_v8 = vpop.xlane.xlu0 %1623 }
 0xf26   :  { %v1625_v59 = vsub.f32 %v1619_v45, %v1624_v8 }
 0xf28   :  { %v1626_v60 = vmul.f32 1.442695, %v1625_v59 }
 0xf29   :  { %v1789_v62 = vpop.xlane.xlu0 %1788 }
 0xf2a   :  { %2691 = vpow2.f32 %v1626_v60  ;;  %v1790_v63 = vsub.f32 %v1784_v52, %v1789_v62 }
 0xf2c   :  { %v1791_v0 = vmul.f32 1.442695, %v1790_v63 }
 0xf2e   :  { %2693 = vpow2.f32 %v1791_v0 }
 0xf2f   :  { %v2688_v2 = vpop.eup %2687 }
 0xf30   :  { %v2690_v3 = vpop.eup %2689  ;;  %v1294_v5 = vsel %vm240_vm3, %v2688_v2, 0.0 }
 0xf31   :  { %1295 = vadd.xlane.f32.xlu1 %v1294_v5  ;;  %v1459_v6 = vsel %vm240_vm3, %v2690_v3, 0.0 }
 0xf32   :  { %1460 = vadd.xlane.f32.xlu0 %v1459_v6 }
 0xf37   :  { %v2692_v9 = vpop.eup %2691 }
 0xf38   :  { %v1628_v10 = vsel %vm240_vm3, %v2692_v9, 0.0 }
 0xf39   :  { %1629 = vadd.xlane.f32.xlu1 %v1628_v10 }
 0xf3b   :  { %v2694_v11 = vpop.eup %2693 }
 0xf3c   :  { %v1793_v12 = vsel %vm240_vm3, %v2694_v11, 0.0 }
 0xf3d   :  { %1794 = vadd.xlane.f32.xlu0 %v1793_v12 }
 0xf4a   :  { %1633 = vrot.lane.b32.xlu1 %v3043_v21, %s2744_s19 }
 0xf4e   :  { %1798 = vrot.lane.b32.xlu1 %v3043_v21, %s2745_s1 }
 0xf53   :  { %1464 = vrot.lane.b32.xlu0 %v3037_v18, %s2745_s1 }
 0xfba   :  { %v1296_v16 = vpop.xlane.xlu1 %1295 }
 0xfbb   :  { %2695 = vrcp.f32 %v1296_v16  ;;  %v1461_v4 = vpop.xlane.xlu0 %1460 }
 0xfbc   :  { %2697 = vrcp.f32 %v1461_v4  ;;  %v2646_v4 = vld [vmem:[%s3211_s4 + $0x10] sm:$0xff]  }
 0xfc2   :  { %v1630_v17 = vpop.xlane.xlu1 %1629 }
 0xfc3   :  { %2699 = vrcp.f32 %v1630_v17 }
 0xfc6   :  { %v1795_v19 = vpop.xlane.xlu0 %1794  ;;  %v1634_v21 = vpop.permute.xlu1 %1633 }
 0xfc7   :  { %2701 = vrcp.f32 %v1795_v19 }
 0xfc8   :  { %v2696_v20 = vpop.eup %2695 }
 0xfc9   :  { %v1298_v22 = vmul.f32 %v2696_v20, %v2688_v2  ;;  %v2698_v23 = vpop.eup %2697 }
 0xfca   :  { %v1465_v27 = vpop.permute.xlu0 %1464  ;;  %v1463_v18 = vmul.f32 %v2698_v23, %v2690_v3  ;;  %v1799_v31 = vpop.permute.xlu1 %1798 }
 0xfcb   :  { %2536 = vmatmul.mubr.msk.f32.vlgmr.msra.gmra.mxu0 %vm240_vm3, %v1298_v22 }
 0xfcc   :  { %2544 = vmatpush3.msra.mxu0 %v1465_v27  ;;  %2545 = vmatprep.mubr.msk.f32.mxu0 %vm2740_vm1, %v2739_v15 }
 0xfcd   :  { %2553 = vmatprep.subr.mxu0 %v2739_v15 }
 0xfcf   :  { %2546 = vmatmul.mubr.msk.f32.vlgmr.msra.gmra.mxu0 %vm240_vm3, %v1463_v18 }
 0xfd0   :  { %v2700_v28 = vpop.eup %2699  ;;  %2554 = vmatpush3.msra.mxu0 %v1634_v21  ;;  %2555 = vmatprep.mubr.msk.f32.mxu0 %vm2740_vm1, %v2739_v15 }
 0xfd1   :  { %2563 = vmatprep.subr.mxu0 %v2739_v15  ;;  %v1632_v29 = vmul.f32 %v2700_v28, %v2692_v9  ;;  %v1971_v28 = vrot.slane %v3020_v1, %v927_v43  ;;  %v2647_v43 = vld [vmem:[%s3212_s5 + $0x38] sm:$0xff]  }
 0xfd3   :  { %2556 = vmatmul.mubr.msk.f32.vlgmr.msra.gmra.mxu0 %vm240_vm3, %v1632_v29 }
 0xfd4   :  { %v2702_v32 = vpop.eup %2701  ;;  %2564 = vmatpush3.msra.mxu0 %v1799_v31  ;;  %2565 = vmatprep.mubr.msk.f32.mxu0 %vm2740_vm1, %v2739_v15 }
 0xfd5   :  { %v1797_v37 = vmul.f32 %v2702_v32, %v2694_v11  ;;  %2576 = vmatprep.subr.bf16.mxu0 %v2739_v15 }
 0xfd7   :  { %2566 = vmatmul.mubr.msk.f32.vlgmr.msra.gmra.mxu0 %vm240_vm3, %v1797_v37  ;;  %v1977_v37 = vrot.slane %v3020_v1, %v933_v48  ;;  %v2648_v48 = vld [vmem:[%s3212_s5 + $0x30] sm:$0xff]  }
 0xfd8   :  { %2580 = vmatprep.mubr.msk.bf16.mxu0 %vm2740_vm1, %v2739_v15 }
0x108b   :  { %v1371_v34 = vpop.f32.mrf.mxu0 }
0x108d   :  { %v2537_v35 = vpop.f32.mrf.mxu0 }
0x108f   :  { %v1536_v40 = vpop.f32.mrf.mxu0 }
0x1091   :  { %v2547_v41 = vpop.f32.mrf.mxu0 }
0x1092   :  { %v2650_v41 = vld [vmem:[%s3212_s5 + $0x20] sm:$0xff]  }
0x1093   :  { %v1705_v42 = vpop.f32.mrf.mxu0 }
0x1095   :  { %v2557_v44 = vpop.f32.mrf.mxu0 }
0x1097   :  { %v1870_v45 = vpop.f32.mrf.mxu0 }
0x1098   :  { %v2626_v47 = vpack.i.bf16 %v1870_v45, %v1536_v40  ;;  %v2649_v40 = vld [vmem:[%s3212_s5 + $0x28] sm:$0xff]  }
0x1099   :  { %v2567_v50 = vpop.f32.mrf.mxu0 }
0x109a   :  { %2627 = vrot.lane.b32.xlu1 %v2626_v47, %s2746_s24 }
0x110c   :  { %v2628_v51 = vpop.permute.xlu1 %2627 }
0x110d   :  { %v2630_v52 = vunpack.i.h.bf16 %v2628_v51  ;;  %v2629_v26 = vunpack.i.l.bf16 %v2628_v51 }
0x110f   :  { %v1878_v49 = vsel %vm165_vm2, %v1705_v42, %v2630_v52  ;;  %v1544_v46 = vsel %vm165_vm2, %v1371_v34, %v2629_v26  ;;  %v1984_v42 = vrot.slane %v3020_v1, %v940_v61 }
0x1110   :  { %v1879_v53 = vpack.c.bf16 %v1878_v49, %v1544_v46 }
0x1112   :  { %2573 = vmatmul.mubr.msk.bf16.vlgmr.msra.gmra.mxu1 %vm37_vm0, %v1879_v53 }
0x1113   :  { %2592 = vmatprep.mubr.msk.bf16.mxu1 %vm2740_vm1, %v2739_v15  ;;  %2585 = vmatpush3.bf16.msra.mxu1 %v2647_v43  ;;  %v33_v43 = vld [vmem:[%s3214_s7 + $0x10] sm:$0xf] }
0x1114   :  { %2586 = vmatprep.subr.bf16.mxu1 %v2739_v15 }
0x1117   :  { %2587 = vmatpush3.bf16.msra.mxu1 %v2648_v48  ;;  %v2163_v48 = vrot.slane %v33_v43, %v2820_v25  ;;  %v2653_v25 = vld [vmem:[%s3213_s6 + $0x18] sm:$0xff]  }
0x1118   :  { %2588 = vmatprep.subr.bf16.mxu1 %v2739_v15 }
0x111b   :  { %2589 = vmatpush3.bf16.msra.mxu1 %v2649_v40 }
0x111c   :  { %2590 = vmatprep.subr.bf16.mxu1 %v2739_v15 }
0x111f   :  { %2591 = vmatpush3.bf16.msra.mxu1 %v2650_v41  ;;  %v2169_v41 = vrot.slane %v33_v43, %v2830_v30  ;;  %v2654_v30 = vld [vmem:[%s3213_s6 + $0x10] sm:$0xff]  }
0x11d2   :  { %v1933_v56 = vpop.f32.mrf.mxu1 }
0x11d3   :  { %v1934_v55 = vadd.f32 %v1933_v56, %v1883_v54 }
0x11d4   :  { %v2574_v57 = vpop.f32.mrf.mxu1 }
0x11d5   :  { %v1940_v58 = vadd.f32 %v1934_v55, %v3026_v13 }
0x11d6   :  { %v1936_v8 = vpop.f32.mrf.mxu1 }
0x11d7   :  { %v1937_v59 = vadd.f32 %v1936_v8, %v1883_v54  ;;  %v1942_v60 = vsel %vm37_vm0, %v1940_v58, 0.0 }
0x11d8   :  { %1943 = vadd.xlane.f32.xlu0 %v1942_v60  ;;  %v2575_v62 = vpop.f32.mrf.mxu1 }
0x11d9   :  { %v1941_v63 = vadd.f32 %v1937_v59, %v3028_v14  ;;  %v2645_v14 = vld [vmem:[%s3211_s4 + $0x18] sm:$0xff]  }
0x11da   :  { %2577 = vmatpush3.bf16.msra.mxu0 %v2645_v14 }
0x11db   :  { %v1945_v0 = vsel %vm37_vm0, %v1941_v63, 0.0  ;;  %2578 = vmatprep.subr.bf16.mxu0 %v2739_v15 }
0x11dc   :  { %1946 = vadd.xlane.f32.xlu1 %v1945_v0 }
0x11de   :  { %2579 = vmatpush3.bf16.msra.mxu0 %v2646_v4 }
0x11df   :  { %2596 = vmatprep.subr.bf16.mxu0 %v2739_v15 }
0x1261   :  { %v1944_v2 = vpop.xlane.xlu0 %1943 }
0x1262   :  { %v1948_v3 = vmul.f32 0.03125, %v1944_v2 }
0x1264   :  { %v1950_v5 = vsub.f32 %v1940_v58, %v1948_v3 }
0x1265   :  { %v1947_v6 = vpop.xlane.xlu1 %1946 }
0x1266   :  { %v1949_v9 = vmul.f32 0.03125, %v1947_v6  ;;  %v1952_v10 = vmul.f32 %v1950_v5, %v1950_v5  ;;  %v2063_v6 = vrot.slane %v3020_v1, %v1019_v36 }
0x1268   :  { %v1951_v11 = vsub.f32 %v1941_v63, %v1949_v9  ;;  %v1954_v13 = vsel %vm37_vm0, %v1952_v10, 0.0 }
0x1269   :  { %1955 = vadd.xlane.f32.xlu0 %v1954_v13 }
0x126a   :  { %v1953_v12 = vmul.f32 %v1951_v11, %v1951_v11 }
0x126c   :  { %v1957_v16 = vsel %vm37_vm0, %v1953_v12, 0.0 }
0x126d   :  { %1958 = vadd.xlane.f32.xlu0 %v1957_v16 }
0x12f2   :  { %v1956_v17 = vpop.xlane.xlu0 %1955 }
0x12f3   :  { %v1960_v19 = vmul.f32 0.03125, %v1956_v17 }
0x12f5   :  { %v1962_v20 = vadd.f32 1e-12, %v1960_v19 }
0x12f6   :  { %v1959_v22 = vpop.xlane.xlu0 %1958 }
0x12f7   :  { %2703 = vrsqrt.f32 %v1962_v20  ;;  %v1961_v23 = vmul.f32 0.03125, %v1959_v22 }
0x12f9   :  { %v1963_v27 = vadd.f32 1e-12, %v1961_v23 }
0x12fb   :  { %2705 = vrsqrt.f32 %v1963_v27 }
0x1304   :  { %v2704_v21 = vpop.eup %2703 }
0x1305   :  { %v1966_v18 = vmul.f32 %v2704_v21, %v1950_v5 }
0x1307   :  { %v1972_v32 = vmul.f32 %v1971_v28, %v1966_v18 }
0x1308   :  { %v2706_v29 = vpop.eup %2705 }
0x1309   :  { %v1967_v31 = vmul.f32 %v2706_v29, %v1951_v11  ;;  %v1978_v34 = vadd.f32 %v1977_v37, %v1972_v32  ;;  %v2651_v29 = vld [vmem:[%s3213_s6 + $0x8] sm:$0xff]  }
0x130b   :  { %v1973_v33 = vmul.f32 %v1971_v28, %v1967_v31  ;;  %v2652_v31 = vld [vmem:[%s3213_s6] sm:$0xff]   ;;  %s2717_s6 = scalar_lea.vmem %s2313_s22, 32 }
0x130c   :  { %p2718_p0 = scmp.ne.s32.totalorder %s2313_s22, %s2717_s6  ;;  %p2723_p2 = scmp.lt.s32.totalorder %s2717_s6, %s2717_s6 }
0x130d   :  { %v1979_v35 = vadd.f32 %v1977_v37, %v1973_v33 }
0x130e   :  { %p2724_p3 = por %p2723_p2, %p2722_p1 }
0x130f   :  { %v1980_v38 = vpack.c.bf16 %v1979_v35, %v1978_v34 }
0x1310   :  { %p2725_p4 = pnand %p2724_p3, %p2718_p0 }
0x1311   :  { %2581 = vmatmul.mubr.msk.bf16.vlgmr.msra.gmra.mxu0 %vm37_vm0, %v1980_v38 }
0x1312   :  { %2600 = vmatprep.mubr.msk.bf16.mxu0 %vm2740_vm1, %v2739_v15  ;;  %2597 = vmatpush3.bf16.msra.mxu0 %v2651_v29 }
0x1313   :  { %2598 = vmatprep.subr.bf16.mxu0 %v2739_v15 }
0x1316   :  { %2599 = vmatpush3.bf16.msra.mxu0 %v2652_v31 }
0x1317   :  { %2604 = vmatprep.subr.bf16.mxu0 %v2739_v15 }
0x13d1   :  { %v2034_v44 = vpop.f32.mrf.mxu0 }
0x13d2   :  { %v2035_v45 = vadd.f32 %v2034_v44, %v1984_v42 }
0x13d3   :  { %v2582_v47 = vpop.f32.mrf.mxu0 }
0x13d4   :  { %v2041_v50 = vmul.f32 %v2035_v45, %v2035_v45 }
0x13d5   :  { %v2037_v51 = vpop.f32.mrf.mxu0 }
0x13d6   :  { %v2043_v52 = vmul.f32 %v2041_v50, %v2035_v45  ;;  %v2038_v26 = vadd.f32 %v2037_v51, %v1984_v42 }
0x13d7   :  { %v2583_v49 = vpop.f32.mrf.mxu0 }
0x13d8   :  { %v2045_v46 = vmul.f32 0.044715, %v2043_v52  ;;  %v2042_v53 = vmul.f32 %v2038_v26, %v2038_v26 }
0x13da   :  { %v2047_v54 = vadd.f32 %v2045_v46, %v2035_v45  ;;  %v2044_v56 = vmul.f32 %v2042_v53, %v2038_v26  ;;  %v2187_v46 = vrot.slane %v33_v43, %v2844_v39 }
0x13dc   :  { %v2049_v55 = vmul.f32 0.7978846, %v2047_v54  ;;  %v2046_v57 = vmul.f32 0.044715, %v2044_v56 }
0x13de   :  { %2707 = vtanh.f32 %v2049_v55  ;;  %v2048_v58 = vadd.f32 %v2046_v57, %v2038_v26 }
0x13e0   :  { %v2050_v8 = vmul.f32 0.7978846, %v2048_v58 }
0x13e2   :  { %2709 = vtanh.f32 %v2050_v8 }
0x13eb   :  { %v2708_v59 = vpop.eup %2707 }
0x13ec   :  { %v2053_v61 = vadd.f32 1.0, %v2708_v59  ;;  %v2248_v59 = vrot.slane %v33_v43, %v2949_v7 }
0x13ee   :  { %v2055_v62 = vmul.f32 0.5, %v2053_v61 }
0x13ef   :  { %v2710_v60 = vpop.eup %2709 }
0x13f0   :  { %v2054_v63 = vadd.f32 1.0, %v2710_v60  ;;  %v2057_v2 = vmul.f32 %v2055_v62, %v2035_v45 }
0x13f2   :  { %v2056_v0 = vmul.f32 0.5, %v2054_v63 }
0x13f4   :  { %v2058_v3 = vmul.f32 %v2056_v0, %v2038_v26 }
0x13f6   :  { %v2059_v5 = vpack.c.bf16 %v2058_v3, %v2057_v2 }
0x13f8   :  { %2593 = vmatmul.mubr.msk.bf16.vlgmr.msra.gmra.mxu1 %vm1045_vm4, %v2059_v5 }
0x14b8   :  { %v2125_v9 = vpop.f32.mrf.mxu1 }
0x14b9   :  { %v2126_v10 = vadd.f32 %v2125_v9, %v2063_v6 }
0x14ba   :  { %v2594_v11 = vpop.f32.mrf.mxu1 }
0x14bb   :  { %v2132_v13 = vadd.f32 %v2126_v10, %v1978_v34 }
0x14bc   :  { %v2128_v12 = vpop.f32.mrf.mxu1 }
0x14bd   :  { %v2129_v16 = vadd.f32 %v2128_v12, %v2063_v6  ;;  %v2134_v14 = vsel %vm37_vm0, %v2132_v13, 0.0 }
0x14be   :  { %2135 = vadd.xlane.f32.xlu0 %v2134_v14  ;;  %v2595_v4 = vpop.f32.mrf.mxu1 }
0x14bf   :  { %v2133_v17 = vadd.f32 %v2129_v16, %v1979_v35 }
0x14c1   :  { %v2137_v19 = vsel %vm37_vm0, %v2133_v17, 0.0 }
0x14c2   :  { %2138 = vadd.xlane.f32.xlu1 %v2137_v19 }
0x1547   :  { %v2136_v20 = vpop.xlane.xlu0 %2135 }
0x1548   :  { %v2140_v22 = vmul.f32 0.03125, %v2136_v20 }
0x154a   :  { %v2142_v23 = vsub.f32 %v2132_v13, %v2140_v22 }
0x154b   :  { %v2139_v24 = vpop.xlane.xlu1 %2138 }
0x154c   :  { %v2141_v27 = vmul.f32 0.03125, %v2139_v24  ;;  %v2144_v36 = vmul.f32 %v2142_v23, %v2142_v23 }
0x154e   :  { %v2143_v1 = vsub.f32 %v2133_v17, %v2141_v27  ;;  %v2146_v21 = vsel %vm37_vm0, %v2144_v36, 0.0 }
0x154f   :  { %2147 = vadd.xlane.f32.xlu0 %v2146_v21 }
0x1550   :  { %v2145_v18 = vmul.f32 %v2143_v1, %v2143_v1 }
0x1552   :  { %v2149_v28 = vsel %vm37_vm0, %v2145_v18, 0.0 }
0x1553   :  { %2150 = vadd.xlane.f32.xlu1 %v2149_v28 }
0x15d8   :  { %v2148_v32 = vpop.xlane.xlu0 %2147 }
0x15d9   :  { %v2152_v37 = vmul.f32 0.03125, %v2148_v32 }
0x15db   :  { %v2154_v33 = vadd.f32 1e-12, %v2152_v37 }
0x15dc   :  { %v2151_v34 = vpop.xlane.xlu1 %2150 }
0x15dd   :  { %2711 = vrsqrt.f32 %v2154_v33  ;;  %v2153_v35 = vmul.f32 0.03125, %v2151_v34 }
0x15df   :  { %v2155_v38 = vadd.f32 1e-12, %v2153_v35 }
0x15e1   :  { %2713 = vrsqrt.f32 %v2155_v38 }
0x15ea   :  { %v2712_v40 = vpop.eup %2711 }
0x15eb   :  { %v2158_v42 = vmul.f32 %v2712_v40, %v2142_v23 }
0x15ed   :  { %v2164_v44 = vmul.f32 %v2163_v48, %v2158_v42 }
0x15ee   :  { %v2714_v45 = vpop.eup %2713 }
0x15ef   :  { %v2170_v47 = vadd.f32 %v2169_v41, %v2164_v44  ;;  %v2159_v50 = vmul.f32 %v2714_v45, %v2143_v1 }
0x15f1   :  { %2172 = vst.msk [vmem:[#allocation2] sm:$0xff] %vm37_vm0, %v2170_v47  ;;  %v2165_v51 = vmul.f32 %v2163_v48, %v2159_v50 }
0x15f3   :  { %v2171_v52 = vadd.f32 %v2169_v41, %v2165_v51 }
0x15f5   :  { %2173 = vst.msk [vmem:[#allocation2 + $0x8] sm:$0xff] %vm37_vm0, %v2171_v52 }
0x15fc   :  { %v2174_v26 = vld [vmem:[#allocation2] ss:$8 sm:$0x3] }
0x15fd   :  { %v2183_v49 = vpack.c.bf16 %v2174_v26, %v2174_v26 }
0x15ff   :  { %2601 = vmatmul.mubr.msk.bf16.vlgmr.msra.gmra.mxu0 %vm37_vm0, %v2183_v49 }
0x1600   :  { %2608 = vmatprep.mubr.msk.bf16.mxu0 %vm2740_vm1, %v2739_v15  ;;  %2605 = vmatpush3.bf16.msra.mxu0 %v2653_v25 }
0x1601   :  { %2606 = vmatprep.subr.bf16.mxu0 %v2739_v15 }
0x1604   :  { %2607 = vmatpush3.bf16.msra.mxu0 %v2654_v30 }
0x16bf   :  { %v2237_v53 = vpop.f32.mrf.mxu0 }
0x16c0   :  { %v2238_v54 = vadd.f32 %v2237_v53, %v2187_v46 }
0x16c1   :  { %v2602_v56 = vpop.f32.mrf.mxu0 }
0x16c2   :  { %2715 = vtanh.f32 %v2238_v54 }
0x16c3   :  { %v2240_v55 = vpop.f32.mrf.mxu0 }
0x16c5   :  { %v2603_v57 = vpop.f32.mrf.mxu0 }
0x16cf   :  { %v2716_v58 = vpop.eup %2715 }
0x16d0   :  { %v2244_v8 = vpack.c.bf16 %v2716_v58, %v2716_v58 }
0x16d2   :  { %2609 = vmatmul.mubr.msk.bf16.vlgmr.msra.gmra.mxu0 %vm37_vm0, %v2244_v8 }
0x1792   :  { %v2298_v15 = vpop.f32.mrf.mxu0 }
0x1793   :  { %v2299_v61 = vadd.f32 %v2298_v15, %v2248_v59 }
0x1794   :  { %v2610_v60 = vpop.f32.mrf.mxu0 }
0x1795   :  { %v2304_v62 = vmax.f32 %v2299_v61, 0.0 }
0x1796   :  { %v2301_v39 = vpop.f32.mrf.mxu0 }
0x1797   :  { %2305 = vst [vmem:[#allocation3] sm:$0x3] %v2304_v62 }
0x1798   :  { %v2611_v63 = vpop.f32.mrf.mxu0 }
0x1799   :  { %2728 = shalt.err (!%p2725_p4)
}
0x179a   :  { %2315 = dma.vmem_to_hbm [thread:$0]  %s2313_s22, 32, %s3215_s8, [#allocation4]  }
0x179b   :  { %2737 = dma.done.wait [#allocation4], 32  }
0x179c   :  { %2738 = vsyncadd [#allocation4], 4294967264 }
0x179d   :  { %2319 = vsyncpa [#allocation4], 1 }

</bundles_post_ra>
